<compile_context>
chip_gen: v5e
topology: v5e:2x2
jax: 0.10.0
libtpu: 0.0.40
codegen_flags: <defaults>
</compile_context>

<pallas_src>
import functools

import jax
import jax.numpy as jnp
import numpy as np
from jax.experimental import pallas as pl
from jax.experimental.pallas import tpu as pltpu

_CP = pltpu.CompilerParams(dimension_semantics=("parallel",))


# ---------------------------------------------------------------------------
# In-kernel helpers
# ---------------------------------------------------------------------------
def _fill_im2col(cols_ref, x, K, pad):
    """Write the K shifted copies of x (L, C) into cols_ref (L, K*C), zero-filling the
    'same'-padding halo.  cols_ref column block t holds x[l + t - pad, :] (or 0 OOB)."""
    L, C = x.shape
    dt = cols_ref.dtype
    for t in range(K):
        s = t - pad
        lo, hi = max(0, -s), L - max(0, s)
        cols_ref[lo:hi, t * C:(t + 1) * C] = x[lo + s:hi + s, :].astype(dt)
        if lo > 0:                                   # top halo rows -> zero
            cols_ref[0:lo, t * C:(t + 1) * C] = jnp.zeros((lo, C), dt)
        if hi < L:                                   # bottom halo rows -> zero
            cols_ref[hi:L, t * C:(t + 1) * C] = jnp.zeros((L - hi, C), dt)


def _group_norm(y, onehot, onehot_t, gamma, beta, eps):
    """Single-pass GroupNorm on y (L, C) f32; onehot (G, C) / onehot_t (C, G) are 0/1
    group indicators.  Stats over (L, channels-in-group), biased variance (PyTorch)."""
    L, C = y.shape
    G = onehot.shape[0]
    inv_n = 1.0 / float(L * (C // G))
    s = jnp.sum(y, axis=0, keepdims=True)                                   # (1, C)
    ss = jnp.sum(y * y, axis=0, keepdims=True)                              # (1, C)
    mean_g = jnp.dot(s, onehot_t, preferred_element_type=jnp.float32) * inv_n   # (1, G)
    msq_g = jnp.dot(ss, onehot_t, preferred_element_type=jnp.float32) * inv_n   # (1, G)
    inv_g = jax.lax.rsqrt(msq_g - mean_g * mean_g + eps)                    # (1, G)
    mean_c = jnp.dot(mean_g, onehot, preferred_element_type=jnp.float32)    # (1, C)
    inv_c = jnp.dot(inv_g, onehot, preferred_element_type=jnp.float32)      # (1, C)
    return (y - mean_c) * inv_c * gamma + beta


# ---------------------------------------------------------------------------
# Pallas kernels (one per fused module)
# ---------------------------------------------------------------------------
def basic_block_kernel(x_ref, m_ref, w1_ref, b1_ref, g_ref, be_ref, oh_ref, oht_ref,
                       wfc_ref, bfc_ref, o_ref, cols_ref, *, K, eps, mxu_dtype):
    """Fused [masked_fill ->] BasicBlock1d:
       x*m -> conv(k=K) -> *m -> GroupNorm -> ReLU -> 1x1 conv -> *m."""
    pad = K // 2
    m = m_ref[0]                                    # (L, 1) 0/1 float mask
    xm = x_ref[0] * m                               # masked_fill before basic_conv
    _fill_im2col(cols_ref, xm, K, pad)
    y = jnp.dot(cols_ref[...].astype(mxu_dtype), w1_ref[...],
                preferred_element_type=jnp.float32) + b1_ref[...]
    y = y * m                                       # masked_fill after conv
    y = _group_norm(y, oh_ref[...], oht_ref[...], g_ref[...], be_ref[...], eps)
    y = jnp.maximum(y, 0.0)                         # ReLU
    y = jnp.dot(y.astype(mxu_dtype), wfc_ref[...],
                preferred_element_type=jnp.float32) + bfc_ref[...]   # out_fc (1x1)
    y = y * m                                       # masked_fill
    o_ref[0, :, :] = y.astype(o_ref.dtype)


def resnet_block_kernel(x_ref, m_ref, wsc_ref,
                        w1_ref, b1_ref, g1_ref, be1_ref, oh1_ref, oh1t_ref,
                        w2_ref, b2_ref, g2_ref, be2_ref, oh2_ref, oh2t_ref,
                        o_ref, cols_ref, *, K, eps, mxu_dtype):
    """Fused [masked_fill ->] ShallowResnetBlock1d:
       xm = x*m; residual = (xm @ Wsc)*m;
       h = ReLU(GN(conv3(xm))*m); h = GN(conv3(h))*m; out = ReLU(residual + h)."""
    pad = K // 2
    m = m_ref[0]
    xm = x_ref[0] * m                                                    # pre-module mask
    residual = jnp.dot(xm.astype(mxu_dtype), wsc_ref[...],
                       preferred_element_type=jnp.float32) * m           # short_cut + mask

    _fill_im2col(cols_ref, xm, K, pad)                                   # block1
    h = jnp.dot(cols_ref[...].astype(mxu_dtype), w1_ref[...],
                preferred_element_type=jnp.float32) + b1_ref[...]
    h = _group_norm(h, oh1_ref[...], oh1t_ref[...], g1_ref[...], be1_ref[...], eps) * m
    h = jnp.maximum(h, 0.0)                                              # outer ReLU

    _fill_im2col(cols_ref, h, K, pad)                                    # block2
    h = jnp.dot(cols_ref[...].astype(mxu_dtype), w2_ref[...],
                preferred_element_type=jnp.float32) + b2_ref[...]
    h = _group_norm(h, oh2_ref[...], oh2t_ref[...], g2_ref[...], be2_ref[...], eps) * m

    o_ref[0, :, :] = jnp.maximum(residual + h, 0.0).astype(o_ref.dtype)


# ---------------------------------------------------------------------------
# Wrappers calling pallas_call
# ---------------------------------------------------------------------------
def _wmat(W, dtype):
    """(K, Cin, Cout) conv weight -> (K*Cin, Cout) im2col matrix."""
    K, Cin, Cout = W.shape
    return W.reshape(K * Cin, Cout).astype(dtype)


def _rep(v):
    """(C,) -> (1, C) lane-dense row vector for in-kernel broadcasting."""
    return v[None, :]


def basic_block(x, mask, p, *, eps=1e-5, mxu_dtype=jnp.float32):
    B, L, Cin = x.shape
    K, _, Cout = p["W"].shape
    G = p["onehot"].shape[0]
    kern = functools.partial(basic_block_kernel, K=K, eps=eps, mxu_dtype=mxu_dtype)
    row = lambda c: pl.BlockSpec((1, c), lambda i: (0, 0))
    mat = lambda r, c: pl.BlockSpec((r, c), lambda i: (0, 0))
    return pl.pallas_call(
        kern,
        out_shape=jax.ShapeDtypeStruct((B, L, Cout), jnp.float32),
        grid=(B,),
        in_specs=[
            pl.BlockSpec((1, L, Cin), lambda i: (i, 0, 0)),
            pl.BlockSpec((1, L, 1), lambda i: (i, 0, 0)),
            mat(K * Cin, Cout),                       # conv weight (im2col layout)
            row(Cout), row(Cout), row(Cout),          # bias, gamma, beta
            mat(G, Cout), mat(Cout, G),               # one-hot group indicator (+T)
            mat(Cout, Cout), row(Cout),               # out_fc weight, bias
        ],
        out_specs=pl.BlockSpec((1, L, Cout), lambda i: (i, 0, 0)),
        scratch_shapes=[pltpu.VMEM((L, K * Cin), jnp.float32)],   # im2col window
        compiler_params=_CP,
    )(x, mask, _wmat(p["W"], mxu_dtype), _rep(p["b"]), _rep(p["gamma"]), _rep(p["beta"]),
      p["onehot"], p["onehot"].T, p["Wfc"].astype(mxu_dtype), _rep(p["bfc"]))


def resnet_block(x, mask, bp, *, eps=1e-5, mxu_dtype=jnp.float32):
    B, L, Cin = x.shape
    Cout = bp["Wsc"].shape[1]
    K = bp["b1_W"].shape[0]
    G = bp["b1_onehot"].shape[0]
    kern = functools.partial(resnet_block_kernel, K=K, eps=eps, mxu_dtype=mxu_dtype)
    row = lambda c: pl.BlockSpec((1, c), lambda i: (0, 0))
    mat = lambda r, c: pl.BlockSpec((r, c), lambda i: (0, 0))
    return pl.pallas_call(
        kern,
        out_shape=jax.ShapeDtypeStruct((B, L, Cout), jnp.float32),
        grid=(B,),
        in_specs=[
            pl.BlockSpec((1, L, Cin), lambda i: (i, 0, 0)),
            pl.BlockSpec((1, L, 1), lambda i: (i, 0, 0)),
            mat(Cin, Cout),                                   # shortcut 1x1 (no bias)
            mat(K * Cin, Cin), row(Cin), row(Cin), row(Cin),  # block1 conv/GN params
            mat(G, Cin), mat(Cin, G),
            mat(K * Cin, Cout), row(Cout), row(Cout), row(Cout),  # block2 conv/GN params
            mat(G, Cout), mat(Cout, G),
        ],
        out_specs=pl.BlockSpec((1, L, Cout), lambda i: (i, 0, 0)),
        scratch_shapes=[pltpu.VMEM((L, K * Cin), jnp.float32)],   # shared im2col window
        compiler_params=_CP,
    )(x, mask, bp["Wsc"].astype(mxu_dtype),
      _wmat(bp["b1_W"], mxu_dtype), _rep(bp["b1_b"]), _rep(bp["b1_gamma"]), _rep(bp["b1_beta"]),
      bp["b1_onehot"], bp["b1_onehot"].T,
      _wmat(bp["b2_W"], mxu_dtype), _rep(bp["b2_b"]), _rep(bp["b2_gamma"]), _rep(bp["b2_beta"]),
      bp["b2_onehot"], bp["b2_onehot"].T)


# ---------------------------------------------------------------------------
# Model: parameters + forward (mirrors ShallowResnet1d semantics)
# ---------------------------------------------------------------------------
def _group_onehot(C, groups):
    cg = C // groups
    grp = jnp.arange(C) // cg
    return (grp[None, :] == jnp.arange(groups)[:, None]).astype(jnp.float32)


def init_params(key, in_dims, basic_out_dims, blocks, dims, groups):
    keys = iter(jax.random.split(key, 512))
    w = lambda shape, s=0.2: s * jax.random.normal(next(keys), shape, jnp.float32)
    g = lambda shape: 1.0 + 0.1 * jax.random.normal(next(keys), shape, jnp.float32)

    params = {
        "basic": dict(
            W=w((7, in_dims, basic_out_dims)), b=w((basic_out_dims,), 0.1),
            gamma=g((basic_out_dims,)), beta=w((basic_out_dims,), 0.1),
            onehot=_group_onehot(basic_out_dims, groups),
            Wfc=w((basic_out_dims, basic_out_dims)), bfc=w((basic_out_dims,), 0.1),
        ),
        "blocks": [],
    }
    curr = basic_out_dims
    for idx, nb in enumerate(blocks):
        for _ in range(nb):
            out = dims[idx]
            params["blocks"].append(dict(
                Wsc=w((curr, out)),                           # short_cut 1x1 conv, no bias
                b1_W=w((3, curr, curr)), b1_b=w((curr,), 0.1),
                b1_gamma=g((curr,)), b1_beta=w((curr,), 0.1),
                b1_onehot=_group_onehot(curr, groups),
                b2_W=w((3, curr, out)), b2_b=w((out,), 0.1),
                b2_gamma=g((out,)), b2_beta=w((out,), 0.1),
                b2_onehot=_group_onehot(out, groups),
            ))
            curr = out
    return params


def shallow_resnet1d_forward(params, x_ncl, mask_bool=None, *, mxu_dtype=jnp.float32):
    """x_ncl: (B, C_in, L) float (PyTorch NCL); mask_bool: (B, 1, L) bool or None.
    mxu_dtype=jnp.bfloat16 uses bf16 MXU operands (f32 accumulation / f32 norm math)."""
    x = jnp.transpose(x_ncl, (0, 2, 1)).astype(jnp.float32)    # -> (B, L, C)
    B, L, _ = x.shape
    if mask_bool is None:
        mask = jnp.ones((B, L, 1), jnp.float32)
    else:
        mask = jnp.transpose(mask_bool, (0, 2, 1)).astype(jnp.float32)

    # BasicBlock1d (with the preceding masked_fill folded in)
    x = basic_block(x, mask, params["basic"], mxu_dtype=mxu_dtype)

    # ShallowResnetBlock1d stack (each kernel folds in the preceding masked_fill)
    for bp in params["blocks"]:
        x = resnet_block(x, mask, bp, mxu_dtype=mxu_dtype)

    # proj_out_conv = Identity (proj_out_dims=None)
    return jnp.transpose(x, (0, 2, 1))                          # back to (B, C, L)


# ---------------------------------------------------------------------------
# Pure-JAX reference (for self-check)
# ---------------------------------------------------------------------------
def _ref_conv1d(x, W, b):
    K = W.shape[0]
    pad = K // 2
    L = x.shape[1]
    xp = jnp.pad(x, ((0, 0), (pad, pad), (0, 0)))
    y = sum(jnp.einsum("blc,cd->bld", xp[:, t:t + L, :], W[t]) for t in range(K))
    return y + b


def _ref_gn(x, gamma, beta, G, eps=1e-5):
    B, L, C = x.shape
    xg = x.reshape(B, L, G, C // G)
    mu = xg.mean(axis=(1, 3), keepdims=True)
    var = ((xg - mu) ** 2).mean(axis=(1, 3), keepdims=True)
    xn = (xg - mu) / jnp.sqrt(var + eps)
    return xn.reshape(B, L, C) * gamma + beta


def ref_forward(params, x_ncl, mask_bool, groups):
    relu = lambda a: jnp.maximum(a, 0.0)
    x = jnp.transpose(x_ncl, (0, 2, 1)).astype(jnp.float32)
    B, L, _ = x.shape
    mask = (jnp.ones((B, L, 1), jnp.float32) if mask_bool is None
            else jnp.transpose(mask_bool, (0, 2, 1)).astype(jnp.float32))
    x = x * mask
    p = params["basic"]
    x = _ref_conv1d(x, p["W"], p["b"]) * mask
    x = relu(_ref_gn(x, p["gamma"], p["beta"], groups))
    x = (jnp.einsum("blc,cd->bld", x, p["Wfc"]) + p["bfc"]) * mask
    for bp in params["blocks"]:
        x = x * mask
        residual = jnp.einsum("blc,cd->bld", x, bp["Wsc"]) * mask
        h = _ref_conv1d(x, bp["b1_W"], bp["b1_b"])
        h = relu(_ref_gn(h, bp["b1_gamma"], bp["b1_beta"], groups) * mask)
        h = _ref_conv1d(h, bp["b2_W"], bp["b2_b"])
        h = _ref_gn(h, bp["b2_gamma"], bp["b2_beta"], groups) * mask
        x = relu(residual + h)
    return jnp.transpose(x, (0, 2, 1))


# ---------------------------------------------------------------------------
if __name__ == "__main__":
    key = jax.random.PRNGKey(0)
    kx, kp = jax.random.split(key)

    # Small config: in_dims=8, basic_out_dims=32, blocks=[1,1], dims=[32,64], groups=4, L=16
    B, Cin, L = 2, 8, 16
    basic_out_dims = 32
    blocks = [1, 1]
    dims = [32, 64]
    groups = 4

    x = jax.random.normal(kx, (B, Cin, L), jnp.float32)
    mask = jnp.ones((B, 1, L), bool).at[:, :, L - 3:].set(False)   # exercise the mask path
    params = init_params(kp, Cin, basic_out_dims, blocks, dims, groups)

    fwd_f32 = jax.jit(functools.partial(shallow_resnet1d_forward, mxu_dtype=jnp.float32))

    # f32 MXU path, with and without mask, against the pure-JAX reference.
    out = jax.block_until_ready(fwd_f32(params, x, mask))
    assert out.shape == (B, dims[-1], L)
    ref = ref_forward(params, x, mask, groups)
    np.testing.assert_allclose(np.asarray(out), np.asarray(ref), rtol=2e-3, atol=2e-3)

    out_nm = jax.block_until_ready(fwd_f32(params, x, None))
    ref_nm = ref_forward(params, x, None, groups)
    np.testing.assert_allclose(np.asarray(out_nm), np.asarray(ref_nm), rtol=2e-3, atol=2e-3)

    # bf16 MXU-operand path (v6e/v7x throughput): loose structural check vs f32 reference.
    fwd_bf16 = jax.jit(functools.partial(shallow_resnet1d_forward, mxu_dtype=jnp.bfloat16))
    out_bf16 = jax.block_until_ready(fwd_bf16(params, x, mask))
    np.testing.assert_allclose(np.asarray(out_bf16), np.asarray(ref), rtol=1e-1, atol=1e-1)

    print("KERNEL_OK")
</pallas_src>

<mosaic_0001>
module attributes {stable_mosaic.version = 11 : i64} {
  func.func @basic_block_kernel(%arg0: i32, %arg1: memref<1x16x8xf32, #tpu.memory_space<vmem>>, %arg2: memref<1x16x1xf32, #tpu.memory_space<vmem>>, %arg3: memref<56x32xf32, #tpu.memory_space<vmem>>, %arg4: memref<1x32xf32, #tpu.memory_space<vmem>>, %arg5: memref<1x32xf32, #tpu.memory_space<vmem>>, %arg6: memref<1x32xf32, #tpu.memory_space<vmem>>, %arg7: memref<4x32xf32, #tpu.memory_space<vmem>>, %arg8: memref<32x4xf32, #tpu.memory_space<vmem>>, %arg9: memref<32x32xf32, #tpu.memory_space<vmem>>, %arg10: memref<1x32xf32, #tpu.memory_space<vmem>>, %arg11: memref<1x16x32xf32, #tpu.memory_space<vmem>>, %arg12: memref<16x56xf32, #tpu.memory_space<vmem>>) attributes {dimension_semantics = [#tpu.dimension_semantics<parallel>], iteration_bounds = array<i64: 2>, scalar_prefetch = 0 : i64, scratch_operands = 1 : i64, tpu.core_type = #tpu.core_type<tc>, window_params = [{transform_indices = @transform_0, window_bounds = array<i64: 1, 16, 8>}, {transform_indices = @transform_1, window_bounds = array<i64: 1, 16, 1>}, {pipeline_mode = #tpu.pipeline_mode<synchronous>, transform_indices = @transform_2, window_bounds = array<i64: 56, 32>}, {pipeline_mode = #tpu.pipeline_mode<synchronous>, transform_indices = @transform_3, window_bounds = array<i64: 1, 32>}, {pipeline_mode = #tpu.pipeline_mode<synchronous>, transform_indices = @transform_4, window_bounds = array<i64: 1, 32>}, {pipeline_mode = #tpu.pipeline_mode<synchronous>, transform_indices = @transform_5, window_bounds = array<i64: 1, 32>}, {pipeline_mode = #tpu.pipeline_mode<synchronous>, transform_indices = @transform_6, window_bounds = array<i64: 4, 32>}, {pipeline_mode = #tpu.pipeline_mode<synchronous>, transform_indices = @transform_7, window_bounds = array<i64: 32, 4>}, {pipeline_mode = #tpu.pipeline_mode<synchronous>, transform_indices = @transform_8, window_bounds = array<i64: 32, 32>}, {pipeline_mode = #tpu.pipeline_mode<synchronous>, transform_indices = @transform_9, window_bounds = array<i64: 1, 32>}, {transform_indices = @transform_10, window_bounds = array<i64: 1, 16, 32>}]} {
    %c0 = arith.constant 0 : index
    %c0_0 = arith.constant 0 : index
    %c0_1 = arith.constant 0 : index
    %0 = vector.load %arg2[%c0, %c0_0, %c0_1] : memref<1x16x1xf32, #tpu.memory_space<vmem>>, vector<1x16x1xf32>
    %1 = vector.shape_cast %0 : vector<1x16x1xf32> to vector<16x1xf32>
    %c0_2 = arith.constant 0 : index
    %c0_3 = arith.constant 0 : index
    %c0_4 = arith.constant 0 : index
    %2 = vector.load %arg1[%c0_2, %c0_3, %c0_4] : memref<1x16x8xf32, #tpu.memory_space<vmem>>, vector<1x16x8xf32>
    %3 = vector.shape_cast %2 : vector<1x16x8xf32> to vector<16x8xf32>
    %4 = vector.broadcast %1 : vector<16x1xf32> to vector<16x8xf32>
    %5 = arith.mulf %3, %4 : vector<16x8xf32>
    %6 = vector.extract_strided_slice %5 {offsets = [0, 0], sizes = [13, 8], strides = [1, 1]} : vector<16x8xf32> to vector<13x8xf32>
    %c3 = arith.constant 3 : index
    %c0_5 = arith.constant 0 : index
    %7 = vector.load %arg12[%c3, %c0_5] : memref<16x56xf32, #tpu.memory_space<vmem>>, vector<13x8xf32>
    tpu.vector_store %arg12[%c3, %c0_5], %6 {strides = array<i32>} : memref<16x56xf32, #tpu.memory_space<vmem>>, vector<13x8xf32>,
    %cst = arith.constant 0.000000e+00 : f32
    %8 = vector.broadcast %cst : f32 to vector<3x8xf32>
    %c0_6 = arith.constant 0 : index
    %c0_7 = arith.constant 0 : index
    %9 = vector.load %arg12[%c0_6, %c0_7] : memref<16x56xf32, #tpu.memory_space<vmem>>, vector<3x8xf32>
    tpu.vector_store %arg12[%c0_6, %c0_7], %8 {strides = array<i32>} : memref<16x56xf32, #tpu.memory_space<vmem>>, vector<3x8xf32>,
    %10 = vector.extract_strided_slice %5 {offsets = [0, 0], sizes = [14, 8], strides = [1, 1]} : vector<16x8xf32> to vector<14x8xf32>
    %c2 = arith.constant 2 : index
    %c8 = arith.constant 8 : index
    %11 = vector.load %arg12[%c2, %c8] : memref<16x56xf32, #tpu.memory_space<vmem>>, vector<14x8xf32>
    tpu.vector_store %arg12[%c2, %c8], %10 {strides = array<i32>} : memref<16x56xf32, #tpu.memory_space<vmem>>, vector<14x8xf32>,
    %cst_8 = arith.constant 0.000000e+00 : f32
    %12 = vector.broadcast %cst_8 : f32 to vector<2x8xf32>
    %c0_9 = arith.constant 0 : index
    %c8_10 = arith.constant 8 : index
    %13 = vector.load %arg12[%c0_9, %c8_10] : memref<16x56xf32, #tpu.memory_space<vmem>>, vector<2x8xf32>
    tpu.vector_store %arg12[%c0_9, %c8_10], %12 {strides = array<i32>} : memref<16x56xf32, #tpu.memory_space<vmem>>, vector<2x8xf32>,
    %14 = vector.extract_strided_slice %5 {offsets = [0, 0], sizes = [15, 8], strides = [1, 1]} : vector<16x8xf32> to vector<15x8xf32>
    %c1 = arith.constant 1 : index
    %c16 = arith.constant 16 : index
    %15 = vector.load %arg12[%c1, %c16] : memref<16x56xf32, #tpu.memory_space<vmem>>, vector<15x8xf32>
    tpu.vector_store %arg12[%c1, %c16], %14 {strides = array<i32>} : memref<16x56xf32, #tpu.memory_space<vmem>>, vector<15x8xf32>,
    %cst_11 = arith.constant 0.000000e+00 : f32
    %16 = vector.broadcast %cst_11 : f32 to vector<1x8xf32>
    %c0_12 = arith.constant 0 : index
    %c16_13 = arith.constant 16 : index
    %17 = vector.load %arg12[%c0_12, %c16_13] : memref<16x56xf32, #tpu.memory_space<vmem>>, vector<1x8xf32>
    tpu.vector_store %arg12[%c0_12, %c16_13], %16 {strides = array<i32>} : memref<16x56xf32, #tpu.memory_space<vmem>>, vector<1x8xf32>,
    %c0_14 = arith.constant 0 : index
    %c24 = arith.constant 24 : index
    %18 = vector.load %arg12[%c0_14, %c24] : memref<16x56xf32, #tpu.memory_space<vmem>>, vector<16x8xf32>
    tpu.vector_store %arg12[%c0_14, %c24], %5 {strides = array<i32>} : memref<16x56xf32, #tpu.memory_space<vmem>>, vector<16x8xf32>,
    %19 = vector.extract_strided_slice %5 {offsets = [1, 0], sizes = [15, 8], strides = [1, 1]} : vector<16x8xf32> to vector<15x8xf32>
    %c0_15 = arith.constant 0 : index
    %c32 = arith.constant 32 : index
    %20 = vector.load %arg12[%c0_15, %c32] : memref<16x56xf32, #tpu.memory_space<vmem>>, vector<15x8xf32>
    tpu.vector_store %arg12[%c0_15, %c32], %19 {strides = array<i32>} : memref<16x56xf32, #tpu.memory_space<vmem>>, vector<15x8xf32>,
    %cst_16 = arith.constant 0.000000e+00 : f32
    %21 = vector.broadcast %cst_16 : f32 to vector<1x8xf32>
    %c15 = arith.constant 15 : index
    %c32_17 = arith.constant 32 : index
    %22 = vector.load %arg12[%c15, %c32_17] : memref<16x56xf32, #tpu.memory_space<vmem>>, vector<1x8xf32>
    tpu.vector_store %arg12[%c15, %c32_17], %21 {strides = array<i32>} : memref<16x56xf32, #tpu.memory_space<vmem>>, vector<1x8xf32>,
    %23 = vector.extract_strided_slice %5 {offsets = [2, 0], sizes = [14, 8], strides = [1, 1]} : vector<16x8xf32> to vector<14x8xf32>
    %c0_18 = arith.constant 0 : index
    %c40 = arith.constant 40 : index
    %24 = vector.load %arg12[%c0_18, %c40] : memref<16x56xf32, #tpu.memory_space<vmem>>, vector<14x8xf32>
    tpu.vector_store %arg12[%c0_18, %c40], %23 {strides = array<i32>} : memref<16x56xf32, #tpu.memory_space<vmem>>, vector<14x8xf32>,
    %cst_19 = arith.constant 0.000000e+00 : f32
    %25 = vector.broadcast %cst_19 : f32 to vector<2x8xf32>
    %c14 = arith.constant 14 : index
    %c40_20 = arith.constant 40 : index
    %26 = vector.load %arg12[%c14, %c40_20] : memref<16x56xf32, #tpu.memory_space<vmem>>, vector<2x8xf32>
    tpu.vector_store %arg12[%c14, %c40_20], %25 {strides = array<i32>} : memref<16x56xf32, #tpu.memory_space<vmem>>, vector<2x8xf32>,
    %27 = vector.extract_strided_slice %5 {offsets = [3, 0], sizes = [13, 8], strides = [1, 1]} : vector<16x8xf32> to vector<13x8xf32>
    %c0_21 = arith.constant 0 : index
    %c48 = arith.constant 48 : index
    %28 = vector.load %arg12[%c0_21, %c48] : memref<16x56xf32, #tpu.memory_space<vmem>>, vector<13x8xf32>
    tpu.vector_store %arg12[%c0_21, %c48], %27 {strides = array<i32>} : memref<16x56xf32, #tpu.memory_space<vmem>>, vector<13x8xf32>,
    %cst_22 = arith.constant 0.000000e+00 : f32
    %29 = vector.broadcast %cst_22 : f32 to vector<3x8xf32>
    %c13 = arith.constant 13 : index
    %c48_23 = arith.constant 48 : index
    %30 = vector.load %arg12[%c13, %c48_23] : memref<16x56xf32, #tpu.memory_space<vmem>>, vector<3x8xf32>
    tpu.vector_store %arg12[%c13, %c48_23], %29 {strides = array<i32>} : memref<16x56xf32, #tpu.memory_space<vmem>>, vector<3x8xf32>,
    %c0_24 = arith.constant 0 : index
    %c0_25 = arith.constant 0 : index
    %31 = vector.load %arg12[%c0_24, %c0_25] : memref<16x56xf32, #tpu.memory_space<vmem>>, vector<16x56xf32>
    %c0_26 = arith.constant 0 : index
    %c0_27 = arith.constant 0 : index
    %32 = vector.load %arg3[%c0_26, %c0_27] : memref<56x32xf32, #tpu.memory_space<vmem>>, vector<56x32xf32>
    %cst_28 = arith.constant dense<0.000000e+00> : vector<16x32xf32>
    %33 = tpu.matmul %31, %32, %cst_28 {dimension_numbers = #tpu.dot_dimension_numbers<[1], [0], [0], [1], [0, 0, 1, 1], [], []>} : vector<16x56xf32>, vector<56x32xf32>, vector<16x32xf32> -> vector<16x32xf32>
    %c0_29 = arith.constant 0 : index
    %c0_30 = arith.constant 0 : index
    %34 = vector.load %arg4[%c0_29, %c0_30] : memref<1x32xf32, #tpu.memory_space<vmem>>, vector<1x32xf32>
    %35 = vector.broadcast %34 : vector<1x32xf32> to vector<16x32xf32>
    %36 = arith.addf %33, %35 : vector<16x32xf32>
    %37 = vector.broadcast %1 : vector<16x1xf32> to vector<16x32xf32>
    %38 = arith.mulf %36, %37 : vector<16x32xf32>
    %c0_31 = arith.constant 0 : index
    %c0_32 = arith.constant 0 : index
    %39 = vector.load %arg7[%c0_31, %c0_32] : memref<4x32xf32, #tpu.memory_space<vmem>>, vector<4x32xf32>
    %c0_33 = arith.constant 0 : index
    %c0_34 = arith.constant 0 : index
    %40 = vector.load %arg8[%c0_33, %c0_34] : memref<32x4xf32, #tpu.memory_space<vmem>>, vector<32x4xf32>
    %c0_35 = arith.constant 0 : index
    %c0_36 = arith.constant 0 : index
    %41 = vector.load %arg5[%c0_35, %c0_36] : memref<1x32xf32, #tpu.memory_space<vmem>>, vector<1x32xf32>
    %c0_37 = arith.constant 0 : index
    %c0_38 = arith.constant 0 : index
    %42 = vector.load %arg6[%c0_37, %c0_38] : memref<1x32xf32, #tpu.memory_space<vmem>>, vector<1x32xf32>
    %cst_39 = arith.constant dense<0.000000e+00> : vector<32xf32>
    %43 = vector.multi_reduction <add>, %38, %cst_39 [0] : vector<16x32xf32> to vector<32xf32>
    %44 = vector.shape_cast %43 : vector<32xf32> to vector<1x32xf32>
    %45 = arith.mulf %38, %38 : vector<16x32xf32>
    %cst_40 = arith.constant dense<0.000000e+00> : vector<32xf32>
    %46 = vector.multi_reduction <add>, %45, %cst_40 [0] : vector<16x32xf32> to vector<32xf32>
    %47 = vector.shape_cast %46 : vector<32xf32> to vector<1x32xf32>
    %cst_41 = arith.constant dense<0.000000e+00> : vector<1x4xf32>
    %48 = tpu.matmul %44, %40, %cst_41 {dimension_numbers = #tpu.dot_dimension_numbers<[1], [0], [0], [1], [0, 0, 1, 1], [], []>} : vector<1x32xf32>, vector<32x4xf32>, vector<1x4xf32> -> vector<1x4xf32>
    %cst_42 = arith.constant 7.812500e-03 : f32
    %49 = vector.broadcast %cst_42 : f32 to vector<1x4xf32>
    %50 = arith.mulf %48, %49 : vector<1x4xf32>
    %cst_43 = arith.constant dense<0.000000e+00> : vector<1x4xf32>
    %51 = tpu.matmul %47, %40, %cst_43 {dimension_numbers = #tpu.dot_dimension_numbers<[1], [0], [0], [1], [0, 0, 1, 1], [], []>} : vector<1x32xf32>, vector<32x4xf32>, vector<1x4xf32> -> vector<1x4xf32>
    %cst_44 = arith.constant 7.812500e-03 : f32
    %52 = vector.broadcast %cst_44 : f32 to vector<1x4xf32>
    %53 = arith.mulf %51, %52 : vector<1x4xf32>
    %54 = arith.mulf %50, %50 : vector<1x4xf32>
    %55 = arith.subf %53, %54 : vector<1x4xf32>
    %cst_45 = arith.constant 9.99999974E-6 : f32
    %56 = vector.broadcast %cst_45 : f32 to vector<1x4xf32>
    %57 = arith.addf %55, %56 : vector<1x4xf32>
    %58 = math.rsqrt %57 : vector<1x4xf32>
    %cst_46 = arith.constant dense<0.000000e+00> : vector<1x32xf32>
    %59 = tpu.matmul %50, %39, %cst_46 {dimension_numbers = #tpu.dot_dimension_numbers<[1], [0], [0], [1], [0, 0, 1, 1], [], []>} : vector<1x4xf32>, vector<4x32xf32>, vector<1x32xf32> -> vector<1x32xf32>
    %cst_47 = arith.constant dense<0.000000e+00> : vector<1x32xf32>
    %60 = tpu.matmul %58, %39, %cst_47 {dimension_numbers = #tpu.dot_dimension_numbers<[1], [0], [0], [1], [0, 0, 1, 1], [], []>} : vector<1x4xf32>, vector<4x32xf32>, vector<1x32xf32> -> vector<1x32xf32>
    %61 = vector.broadcast %59 : vector<1x32xf32> to vector<16x32xf32>
    %62 = arith.subf %38, %61 : vector<16x32xf32>
    %63 = vector.broadcast %60 : vector<1x32xf32> to vector<16x32xf32>
    %64 = arith.mulf %62, %63 : vector<16x32xf32>
    %65 = vector.broadcast %41 : vector<1x32xf32> to vector<16x32xf32>
    %66 = arith.mulf %64, %65 : vector<16x32xf32>
    %67 = vector.broadcast %42 : vector<1x32xf32> to vector<16x32xf32>
    %68 = arith.addf %66, %67 : vector<16x32xf32>
    %cst_48 = arith.constant 0.000000e+00 : f32
    %69 = vector.broadcast %cst_48 : f32 to vector<16x32xf32>
    %70 = arith.maximumf %68, %69 : vector<16x32xf32>
    %c0_49 = arith.constant 0 : index
    %c0_50 = arith.constant 0 : index
    %71 = vector.load %arg9[%c0_49, %c0_50] : memref<32x32xf32, #tpu.memory_space<vmem>>, vector<32x32xf32>
    %cst_51 = arith.constant dense<0.000000e+00> : vector<16x32xf32>
    %72 = tpu.matmul %70, %71, %cst_51 {dimension_numbers = #tpu.dot_dimension_numbers<[1], [0], [0], [1], [0, 0, 1, 1], [], []>} : vector<16x32xf32>, vector<32x32xf32>, vector<16x32xf32> -> vector<16x32xf32>
    %c0_52 = arith.constant 0 : index
    %c0_53 = arith.constant 0 : index
    %73 = vector.load %arg10[%c0_52, %c0_53] : memref<1x32xf32, #tpu.memory_space<vmem>>, vector<1x32xf32>
    %74 = vector.broadcast %73 : vector<1x32xf32> to vector<16x32xf32>
    %75 = arith.addf %72, %74 : vector<16x32xf32>
    %76 = vector.broadcast %1 : vector<16x1xf32> to vector<16x32xf32>
    %77 = arith.mulf %75, %76 : vector<16x32xf32>
    %c0_54 = arith.constant 0 : index
    %c0_55 = arith.constant 0 : index
    %c0_56 = arith.constant 0 : index
    %78 = vector.load %arg11[%c0_54, %c0_55, %c0_56] : memref<1x16x32xf32, #tpu.memory_space<vmem>>, vector<1x16x32xf32>
    %79 = vector.shape_cast %78 : vector<1x16x32xf32> to vector<16x32xf32>
    %80 = vector.shape_cast %77 : vector<16x32xf32> to vector<1x16x32xf32>
    tpu.vector_store %arg11[%c0_54, %c0_55, %c0_56], %80 {strides = array<i32>} : memref<1x16x32xf32, #tpu.memory_space<vmem>>, vector<1x16x32xf32>,
    return
  }
  func.func @transform_0(%arg0: i32) -> (i32, i32, i32) {
    %c0_i32 = arith.constant 0 : i32
    %c0_i32_0 = arith.constant 0 : i32
    %c0_i32_1 = arith.constant 0 : i32
    return %arg0, %c0_i32, %c0_i32_0 : i32, i32, i32
  }
  func.func @transform_1(%arg0: i32) -> (i32, i32, i32) {
    %c0_i32 = arith.constant 0 : i32
    %c0_i32_0 = arith.constant 0 : i32
    %c0_i32_1 = arith.constant 0 : i32
    return %arg0, %c0_i32, %c0_i32_0 : i32, i32, i32
  }
  func.func @transform_2(%arg0: i32) -> (i32, i32) {
    %c0_i32 = arith.constant 0 : i32
    %c0_i32_0 = arith.constant 0 : i32
    %c0_i32_1 = arith.constant 0 : i32
    return %c0_i32, %c0_i32_0 : i32, i32
  }
  func.func @transform_3(%arg0: i32) -> (i32, i32) {
    %c0_i32 = arith.constant 0 : i32
    %c0_i32_0 = arith.constant 0 : i32
    %c0_i32_1 = arith.constant 0 : i32
    return %c0_i32, %c0_i32_0 : i32, i32
  }
  func.func @transform_4(%arg0: i32) -> (i32, i32) {
    %c0_i32 = arith.constant 0 : i32
    %c0_i32_0 = arith.constant 0 : i32
    %c0_i32_1 = arith.constant 0 : i32
    return %c0_i32, %c0_i32_0 : i32, i32
  }
  func.func @transform_5(%arg0: i32) -> (i32, i32) {
    %c0_i32 = arith.constant 0 : i32
    %c0_i32_0 = arith.constant 0 : i32
    %c0_i32_1 = arith.constant 0 : i32
    return %c0_i32, %c0_i32_0 : i32, i32
  }
  func.func @transform_6(%arg0: i32) -> (i32, i32) {
    %c0_i32 = arith.constant 0 : i32
    %c0_i32_0 = arith.constant 0 : i32
    %c0_i32_1 = arith.constant 0 : i32
    return %c0_i32, %c0_i32_0 : i32, i32
  }
  func.func @transform_7(%arg0: i32) -> (i32, i32) {
    %c0_i32 = arith.constant 0 : i32
    %c0_i32_0 = arith.constant 0 : i32
    %c0_i32_1 = arith.constant 0 : i32
    return %c0_i32, %c0_i32_0 : i32, i32
  }
  func.func @transform_8(%arg0: i32) -> (i32, i32) {
    %c0_i32 = arith.constant 0 : i32
    %c0_i32_0 = arith.constant 0 : i32
    %c0_i32_1 = arith.constant 0 : i32
    return %c0_i32, %c0_i32_0 : i32, i32
  }
  func.func @transform_9(%arg0: i32) -> (i32, i32) {
    %c0_i32 = arith.constant 0 : i32
    %c0_i32_0 = arith.constant 0 : i32
    %c0_i32_1 = arith.constant 0 : i32
    return %c0_i32, %c0_i32_0 : i32, i32
  }
  func.func @transform_10(%arg0: i32) -> (i32, i32, i32) {
    %c0_i32 = arith.constant 0 : i32
    %c0_i32_0 = arith.constant 0 : i32
    %c0_i32_1 = arith.constant 0 : i32
    return %arg0, %c0_i32, %c0_i32_0 : i32, i32, i32
  }
}

module attributes {stable_mosaic.version = 11 : i64} {
  func.func @resnet_block_kernel(%arg0: i32, %arg1: memref<1x16x32xf32, #tpu.memory_space<vmem>>, %arg2: memref<1x16x1xf32, #tpu.memory_space<vmem>>, %arg3: memref<32x32xf32, #tpu.memory_space<vmem>>, %arg4: memref<96x32xf32, #tpu.memory_space<vmem>>, %arg5: memref<1x32xf32, #tpu.memory_space<vmem>>, %arg6: memref<1x32xf32, #tpu.memory_space<vmem>>, %arg7: memref<1x32xf32, #tpu.memory_space<vmem>>, %arg8: memref<4x32xf32, #tpu.memory_space<vmem>>, %arg9: memref<32x4xf32, #tpu.memory_space<vmem>>, %arg10: memref<96x32xf32, #tpu.memory_space<vmem>>, %arg11: memref<1x32xf32, #tpu.memory_space<vmem>>, %arg12: memref<1x32xf32, #tpu.memory_space<vmem>>, %arg13: memref<1x32xf32, #tpu.memory_space<vmem>>, %arg14: memref<4x32xf32, #tpu.memory_space<vmem>>, %arg15: memref<32x4xf32, #tpu.memory_space<vmem>>, %arg16: memref<1x16x32xf32, #tpu.memory_space<vmem>>, %arg17: memref<16x96xf32, #tpu.memory_space<vmem>>) attributes {dimension_semantics = [#tpu.dimension_semantics<parallel>], iteration_bounds = array<i64: 2>, scalar_prefetch = 0 : i64, scratch_operands = 1 : i64, tpu.core_type = #tpu.core_type<tc>, window_params = [{transform_indices = @transform_0, window_bounds = array<i64: 1, 16, 32>}, {transform_indices = @transform_1, window_bounds = array<i64: 1, 16, 1>}, {pipeline_mode = #tpu.pipeline_mode<synchronous>, transform_indices = @transform_2, window_bounds = array<i64: 32, 32>}, {pipeline_mode = #tpu.pipeline_mode<synchronous>, transform_indices = @transform_3, window_bounds = array<i64: 96, 32>}, {pipeline_mode = #tpu.pipeline_mode<synchronous>, transform_indices = @transform_4, window_bounds = array<i64: 1, 32>}, {pipeline_mode = #tpu.pipeline_mode<synchronous>, transform_indices = @transform_5, window_bounds = array<i64: 1, 32>}, {pipeline_mode = #tpu.pipeline_mode<synchronous>, transform_indices = @transform_6, window_bounds = array<i64: 1, 32>}, {pipeline_mode = #tpu.pipeline_mode<synchronous>, transform_indices = @transform_7, window_bounds = array<i64: 4, 32>}, {pipeline_mode = #tpu.pipeline_mode<synchronous>, transform_indices = @transform_8, window_bounds = array<i64: 32, 4>}, {pipeline_mode = #tpu.pipeline_mode<synchronous>, transform_indices = @transform_9, window_bounds = array<i64: 96, 32>}, {pipeline_mode = #tpu.pipeline_mode<synchronous>, transform_indices = @transform_10, window_bounds = array<i64: 1, 32>}, {pipeline_mode = #tpu.pipeline_mode<synchronous>, transform_indices = @transform_11, window_bounds = array<i64: 1, 32>}, {pipeline_mode = #tpu.pipeline_mode<synchronous>, transform_indices = @transform_12, window_bounds = array<i64: 1, 32>}, {pipeline_mode = #tpu.pipeline_mode<synchronous>, transform_indices = @transform_13, window_bounds = array<i64: 4, 32>}, {pipeline_mode = #tpu.pipeline_mode<synchronous>, transform_indices = @transform_14, window_bounds = array<i64: 32, 4>}, {transform_indices = @transform_15, window_bounds = array<i64: 1, 16, 32>}]} {
    %c0 = arith.constant 0 : index
    %c0_0 = arith.constant 0 : index
    %c0_1 = arith.constant 0 : index
    %0 = vector.load %arg2[%c0, %c0_0, %c0_1] : memref<1x16x1xf32, #tpu.memory_space<vmem>>, vector<1x16x1xf32>
    %1 = vector.shape_cast %0 : vector<1x16x1xf32> to vector<16x1xf32>
    %c0_2 = arith.constant 0 : index
    %c0_3 = arith.constant 0 : index
    %c0_4 = arith.constant 0 : index
    %2 = vector.load %arg1[%c0_2, %c0_3, %c0_4] : memref<1x16x32xf32, #tpu.memory_space<vmem>>, vector<1x16x32xf32>
    %3 = vector.shape_cast %2 : vector<1x16x32xf32> to vector<16x32xf32>
    %4 = vector.broadcast %1 : vector<16x1xf32> to vector<16x32xf32>
    %5 = arith.mulf %3, %4 : vector<16x32xf32>
    %c0_5 = arith.constant 0 : index
    %c0_6 = arith.constant 0 : index
    %6 = vector.load %arg3[%c0_5, %c0_6] : memref<32x32xf32, #tpu.memory_space<vmem>>, vector<32x32xf32>
    %cst = arith.constant dense<0.000000e+00> : vector<16x32xf32>
    %7 = tpu.matmul %5, %6, %cst {dimension_numbers = #tpu.dot_dimension_numbers<[1], [0], [0], [1], [0, 0, 1, 1], [], []>} : vector<16x32xf32>, vector<32x32xf32>, vector<16x32xf32> -> vector<16x32xf32>
    %8 = vector.broadcast %1 : vector<16x1xf32> to vector<16x32xf32>
    %9 = arith.mulf %7, %8 : vector<16x32xf32>
    %10 = vector.extract_strided_slice %5 {offsets = [0, 0], sizes = [15, 32], strides = [1, 1]} : vector<16x32xf32> to vector<15x32xf32>
    %c1 = arith.constant 1 : index
    %c0_7 = arith.constant 0 : index
    %11 = vector.load %arg17[%c1, %c0_7] : memref<16x96xf32, #tpu.memory_space<vmem>>, vector<15x32xf32>
    tpu.vector_store %arg17[%c1, %c0_7], %10 {strides = array<i32>} : memref<16x96xf32, #tpu.memory_space<vmem>>, vector<15x32xf32>,
    %cst_8 = arith.constant 0.000000e+00 : f32
    %12 = vector.broadcast %cst_8 : f32 to vector<1x32xf32>
    %c0_9 = arith.constant 0 : index
    %c0_10 = arith.constant 0 : index
    %13 = vector.load %arg17[%c0_9, %c0_10] : memref<16x96xf32, #tpu.memory_space<vmem>>, vector<1x32xf32>
    tpu.vector_store %arg17[%c0_9, %c0_10], %12 {strides = array<i32>} : memref<16x96xf32, #tpu.memory_space<vmem>>, vector<1x32xf32>,
    %c0_11 = arith.constant 0 : index
    %c32 = arith.constant 32 : index
    %14 = vector.load %arg17[%c0_11, %c32] : memref<16x96xf32, #tpu.memory_space<vmem>>, vector<16x32xf32>
    tpu.vector_store %arg17[%c0_11, %c32], %5 {strides = array<i32>} : memref<16x96xf32, #tpu.memory_space<vmem>>, vector<16x32xf32>,
    %15 = vector.extract_strided_slice %5 {offsets = [1, 0], sizes = [15, 32], strides = [1, 1]} : vector<16x32xf32> to vector<15x32xf32>
    %c0_12 = arith.constant 0 : index
    %c64 = arith.constant 64 : index
    %16 = vector.load %arg17[%c0_12, %c64] : memref<16x96xf32, #tpu.memory_space<vmem>>, vector<15x32xf32>
    tpu.vector_store %arg17[%c0_12, %c64], %15 {strides = array<i32>} : memref<16x96xf32, #tpu.memory_space<vmem>>, vector<15x32xf32>,
    %cst_13 = arith.constant 0.000000e+00 : f32
    %17 = vector.broadcast %cst_13 : f32 to vector<1x32xf32>
    %c15 = arith.constant 15 : index
    %c64_14 = arith.constant 64 : index
    %18 = vector.load %arg17[%c15, %c64_14] : memref<16x96xf32, #tpu.memory_space<vmem>>, vector<1x32xf32>
    tpu.vector_store %arg17[%c15, %c64_14], %17 {strides = array<i32>} : memref<16x96xf32, #tpu.memory_space<vmem>>, vector<1x32xf32>,
    %c0_15 = arith.constant 0 : index
    %c0_16 = arith.constant 0 : index
    %19 = vector.load %arg17[%c0_15, %c0_16] : memref<16x96xf32, #tpu.memory_space<vmem>>, vector<16x96xf32>
    %c0_17 = arith.constant 0 : index
    %c0_18 = arith.constant 0 : index
    %20 = vector.load %arg4[%c0_17, %c0_18] : memref<96x32xf32, #tpu.memory_space<vmem>>, vector<96x32xf32>
    %cst_19 = arith.constant dense<0.000000e+00> : vector<16x32xf32>
    %21 = tpu.matmul %19, %20, %cst_19 {dimension_numbers = #tpu.dot_dimension_numbers<[1], [0], [0], [1], [0, 0, 1, 1], [], []>} : vector<16x96xf32>, vector<96x32xf32>, vector<16x32xf32> -> vector<16x32xf32>
    %c0_20 = arith.constant 0 : index
    %c0_21 = arith.constant 0 : index
    %22 = vector.load %arg5[%c0_20, %c0_21] : memref<1x32xf32, #tpu.memory_space<vmem>>, vector<1x32xf32>
    %23 = vector.broadcast %22 : vector<1x32xf32> to vector<16x32xf32>
    %24 = arith.addf %21, %23 : vector<16x32xf32>
    %c0_22 = arith.constant 0 : index
    %c0_23 = arith.constant 0 : index
    %25 = vector.load %arg8[%c0_22, %c0_23] : memref<4x32xf32, #tpu.memory_space<vmem>>, vector<4x32xf32>
    %c0_24 = arith.constant 0 : index
    %c0_25 = arith.constant 0 : index
    %26 = vector.load %arg9[%c0_24, %c0_25] : memref<32x4xf32, #tpu.memory_space<vmem>>, vector<32x4xf32>
    %c0_26 = arith.constant 0 : index
    %c0_27 = arith.constant 0 : index
    %27 = vector.load %arg6[%c0_26, %c0_27] : memref<1x32xf32, #tpu.memory_space<vmem>>, vector<1x32xf32>
    %c0_28 = arith.constant 0 : index
    %c0_29 = arith.constant 0 : index
    %28 = vector.load %arg7[%c0_28, %c0_29] : memref<1x32xf32, #tpu.memory_space<vmem>>, vector<1x32xf32>
    %cst_30 = arith.constant dense<0.000000e+00> : vector<32xf32>
    %29 = vector.multi_reduction <add>, %24, %cst_30 [0] : vector<16x32xf32> to vector<32xf32>
    %30 = vector.shape_cast %29 : vector<32xf32> to vector<1x32xf32>
    %31 = arith.mulf %24, %24 : vector<16x32xf32>
    %cst_31 = arith.constant dense<0.000000e+00> : vector<32xf32>
    %32 = vector.multi_reduction <add>, %31, %cst_31 [0] : vector<16x32xf32> to vector<32xf32>
    %33 = vector.shape_cast %32 : vector<32xf32> to vector<1x32xf32>
    %cst_32 = arith.constant dense<0.000000e+00> : vector<1x4xf32>
    %34 = tpu.matmul %30, %26, %cst_32 {dimension_numbers = #tpu.dot_dimension_numbers<[1], [0], [0], [1], [0, 0, 1, 1], [], []>} : vector<1x32xf32>, vector<32x4xf32>, vector<1x4xf32> -> vector<1x4xf32>
    %cst_33 = arith.constant 7.812500e-03 : f32
    %35 = vector.broadcast %cst_33 : f32 to vector<1x4xf32>
    %36 = arith.mulf %34, %35 : vector<1x4xf32>
    %cst_34 = arith.constant dense<0.000000e+00> : vector<1x4xf32>
    %37 = tpu.matmul %33, %26, %cst_34 {dimension_numbers = #tpu.dot_dimension_numbers<[1], [0], [0], [1], [0, 0, 1, 1], [], []>} : vector<1x32xf32>, vector<32x4xf32>, vector<1x4xf32> -> vector<1x4xf32>
    %cst_35 = arith.constant 7.812500e-03 : f32
    %38 = vector.broadcast %cst_35 : f32 to vector<1x4xf32>
    %39 = arith.mulf %37, %38 : vector<1x4xf32>
    %40 = arith.mulf %36, %36 : vector<1x4xf32>
    %41 = arith.subf %39, %40 : vector<1x4xf32>
    %cst_36 = arith.constant 9.99999974E-6 : f32
    %42 = vector.broadcast %cst_36 : f32 to vector<1x4xf32>
    %43 = arith.addf %41, %42 : vector<1x4xf32>
    %44 = math.rsqrt %43 : vector<1x4xf32>
    %cst_37 = arith.constant dense<0.000000e+00> : vector<1x32xf32>
    %45 = tpu.matmul %36, %25, %cst_37 {dimension_numbers = #tpu.dot_dimension_numbers<[1], [0], [0], [1], [0, 0, 1, 1], [], []>} : vector<1x4xf32>, vector<4x32xf32>, vector<1x32xf32> -> vector<1x32xf32>
    %cst_38 = arith.constant dense<0.000000e+00> : vector<1x32xf32>
    %46 = tpu.matmul %44, %25, %cst_38 {dimension_numbers = #tpu.dot_dimension_numbers<[1], [0], [0], [1], [0, 0, 1, 1], [], []>} : vector<1x4xf32>, vector<4x32xf32>, vector<1x32xf32> -> vector<1x32xf32>
    %47 = vector.broadcast %45 : vector<1x32xf32> to vector<16x32xf32>
    %48 = arith.subf %24, %47 : vector<16x32xf32>
    %49 = vector.broadcast %46 : vector<1x32xf32> to vector<16x32xf32>
    %50 = arith.mulf %48, %49 : vector<16x32xf32>
    %51 = vector.broadcast %27 : vector<1x32xf32> to vector<16x32xf32>
    %52 = arith.mulf %50, %51 : vector<16x32xf32>
    %53 = vector.broadcast %28 : vector<1x32xf32> to vector<16x32xf32>
    %54 = arith.addf %52, %53 : vector<16x32xf32>
    %55 = vector.broadcast %1 : vector<16x1xf32> to vector<16x32xf32>
    %56 = arith.mulf %54, %55 : vector<16x32xf32>
    %cst_39 = arith.constant 0.000000e+00 : f32
    %57 = vector.broadcast %cst_39 : f32 to vector<16x32xf32>
    %58 = arith.maximumf %56, %57 : vector<16x32xf32>
    %59 = vector.extract_strided_slice %58 {offsets = [0, 0], sizes = [15, 32], strides = [1, 1]} : vector<16x32xf32> to vector<15x32xf32>
    %c1_40 = arith.constant 1 : index
    %c0_41 = arith.constant 0 : index
    %60 = vector.load %arg17[%c1_40, %c0_41] : memref<16x96xf32, #tpu.memory_space<vmem>>, vector<15x32xf32>
    tpu.vector_store %arg17[%c1_40, %c0_41], %59 {strides = array<i32>} : memref<16x96xf32, #tpu.memory_space<vmem>>, vector<15x32xf32>,
    %cst_42 = arith.constant 0.000000e+00 : f32
    %61 = vector.broadcast %cst_42 : f32 to vector<1x32xf32>
    %c0_43 = arith.constant 0 : index
    %c0_44 = arith.constant 0 : index
    %62 = vector.load %arg17[%c0_43, %c0_44] : memref<16x96xf32, #tpu.memory_space<vmem>>, vector<1x32xf32>
    tpu.vector_store %arg17[%c0_43, %c0_44], %61 {strides = array<i32>} : memref<16x96xf32, #tpu.memory_space<vmem>>, vector<1x32xf32>,
    %c0_45 = arith.constant 0 : index
    %c32_46 = arith.constant 32 : index
    %63 = vector.load %arg17[%c0_45, %c32_46] : memref<16x96xf32, #tpu.memory_space<vmem>>, vector<16x32xf32>
    tpu.vector_store %arg17[%c0_45, %c32_46], %58 {strides = array<i32>} : memref<16x96xf32, #tpu.memory_space<vmem>>, vector<16x32xf32>,
    %64 = vector.extract_strided_slice %58 {offsets = [1, 0], sizes = [15, 32], strides = [1, 1]} : vector<16x32xf32> to vector<15x32xf32>
    %c0_47 = arith.constant 0 : index
    %c64_48 = arith.constant 64 : index
    %65 = vector.load %arg17[%c0_47, %c64_48] : memref<16x96xf32, #tpu.memory_space<vmem>>, vector<15x32xf32>
    tpu.vector_store %arg17[%c0_47, %c64_48], %64 {strides = array<i32>} : memref<16x96xf32, #tpu.memory_space<vmem>>, vector<15x32xf32>,
    %cst_49 = arith.constant 0.000000e+00 : f32
    %66 = vector.broadcast %cst_49 : f32 to vector<1x32xf32>
    %c15_50 = arith.constant 15 : index
    %c64_51 = arith.constant 64 : index
    %67 = vector.load %arg17[%c15_50, %c64_51] : memref<16x96xf32, #tpu.memory_space<vmem>>, vector<1x32xf32>
    tpu.vector_store %arg17[%c15_50, %c64_51], %66 {strides = array<i32>} : memref<16x96xf32, #tpu.memory_space<vmem>>, vector<1x32xf32>,
    %c0_52 = arith.constant 0 : index
    %c0_53 = arith.constant 0 : index
    %68 = vector.load %arg17[%c0_52, %c0_53] : memref<16x96xf32, #tpu.memory_space<vmem>>, vector<16x96xf32>
    %c0_54 = arith.constant 0 : index
    %c0_55 = arith.constant 0 : index
    %69 = vector.load %arg10[%c0_54, %c0_55] : memref<96x32xf32, #tpu.memory_space<vmem>>, vector<96x32xf32>
    %cst_56 = arith.constant dense<0.000000e+00> : vector<16x32xf32>
    %70 = tpu.matmul %68, %69, %cst_56 {dimension_numbers = #tpu.dot_dimension_numbers<[1], [0], [0], [1], [0, 0, 1, 1], [], []>} : vector<16x96xf32>, vector<96x32xf32>, vector<16x32xf32> -> vector<16x32xf32>
    %c0_57 = arith.constant 0 : index
    %c0_58 = arith.constant 0 : index
    %71 = vector.load %arg11[%c0_57, %c0_58] : memref<1x32xf32, #tpu.memory_space<vmem>>, vector<1x32xf32>
    %72 = vector.broadcast %71 : vector<1x32xf32> to vector<16x32xf32>
    %73 = arith.addf %70, %72 : vector<16x32xf32>
    %c0_59 = arith.constant 0 : index
    %c0_60 = arith.constant 0 : index
    %74 = vector.load %arg14[%c0_59, %c0_60] : memref<4x32xf32, #tpu.memory_space<vmem>>, vector<4x32xf32>
    %c0_61 = arith.constant 0 : index
    %c0_62 = arith.constant 0 : index
    %75 = vector.load %arg15[%c0_61, %c0_62] : memref<32x4xf32, #tpu.memory_space<vmem>>, vector<32x4xf32>
    %c0_63 = arith.constant 0 : index
    %c0_64 = arith.constant 0 : index
    %76 = vector.load %arg12[%c0_63, %c0_64] : memref<1x32xf32, #tpu.memory_space<vmem>>, vector<1x32xf32>
    %c0_65 = arith.constant 0 : index
    %c0_66 = arith.constant 0 : index
    %77 = vector.load %arg13[%c0_65, %c0_66] : memref<1x32xf32, #tpu.memory_space<vmem>>, vector<1x32xf32>
    %cst_67 = arith.constant dense<0.000000e+00> : vector<32xf32>
    %78 = vector.multi_reduction <add>, %73, %cst_67 [0] : vector<16x32xf32> to vector<32xf32>
    %79 = vector.shape_cast %78 : vector<32xf32> to vector<1x32xf32>
    %80 = arith.mulf %73, %73 : vector<16x32xf32>
    %cst_68 = arith.constant dense<0.000000e+00> : vector<32xf32>
    %81 = vector.multi_reduction <add>, %80, %cst_68 [0] : vector<16x32xf32> to vector<32xf32>
    %82 = vector.shape_cast %81 : vector<32xf32> to vector<1x32xf32>
    %cst_69 = arith.constant dense<0.000000e+00> : vector<1x4xf32>
    %83 = tpu.matmul %79, %75, %cst_69 {dimension_numbers = #tpu.dot_dimension_numbers<[1], [0], [0], [1], [0, 0, 1, 1], [], []>} : vector<1x32xf32>, vector<32x4xf32>, vector<1x4xf32> -> vector<1x4xf32>
    %cst_70 = arith.constant 7.812500e-03 : f32
    %84 = vector.broadcast %cst_70 : f32 to vector<1x4xf32>
    %85 = arith.mulf %83, %84 : vector<1x4xf32>
    %cst_71 = arith.constant dense<0.000000e+00> : vector<1x4xf32>
    %86 = tpu.matmul %82, %75, %cst_71 {dimension_numbers = #tpu.dot_dimension_numbers<[1], [0], [0], [1], [0, 0, 1, 1], [], []>} : vector<1x32xf32>, vector<32x4xf32>, vector<1x4xf32> -> vector<1x4xf32>
    %cst_72 = arith.constant 7.812500e-03 : f32
    %87 = vector.broadcast %cst_72 : f32 to vector<1x4xf32>
    %88 = arith.mulf %86, %87 : vector<1x4xf32>
    %89 = arith.mulf %85, %85 : vector<1x4xf32>
    %90 = arith.subf %88, %89 : vector<1x4xf32>
    %cst_73 = arith.constant 9.99999974E-6 : f32
    %91 = vector.broadcast %cst_73 : f32 to vector<1x4xf32>
    %92 = arith.addf %90, %91 : vector<1x4xf32>
    %93 = math.rsqrt %92 : vector<1x4xf32>
    %cst_74 = arith.constant dense<0.000000e+00> : vector<1x32xf32>
    %94 = tpu.matmul %85, %74, %cst_74 {dimension_numbers = #tpu.dot_dimension_numbers<[1], [0], [0], [1], [0, 0, 1, 1], [], []>} : vector<1x4xf32>, vector<4x32xf32>, vector<1x32xf32> -> vector<1x32xf32>
    %cst_75 = arith.constant dense<0.000000e+00> : vector<1x32xf32>
    %95 = tpu.matmul %93, %74, %cst_75 {dimension_numbers = #tpu.dot_dimension_numbers<[1], [0], [0], [1], [0, 0, 1, 1], [], []>} : vector<1x4xf32>, vector<4x32xf32>, vector<1x32xf32> -> vector<1x32xf32>
    %96 = vector.broadcast %94 : vector<1x32xf32> to vector<16x32xf32>
    %97 = arith.subf %73, %96 : vector<16x32xf32>
    %98 = vector.broadcast %95 : vector<1x32xf32> to vector<16x32xf32>
    %99 = arith.mulf %97, %98 : vector<16x32xf32>
    %100 = vector.broadcast %76 : vector<1x32xf32> to vector<16x32xf32>
    %101 = arith.mulf %99, %100 : vector<16x32xf32>
    %102 = vector.broadcast %77 : vector<1x32xf32> to vector<16x32xf32>
    %103 = arith.addf %101, %102 : vector<16x32xf32>
    %104 = vector.broadcast %1 : vector<16x1xf32> to vector<16x32xf32>
    %105 = arith.mulf %103, %104 : vector<16x32xf32>
    %106 = arith.addf %9, %105 : vector<16x32xf32>
    %cst_76 = arith.constant 0.000000e+00 : f32
    %107 = vector.broadcast %cst_76 : f32 to vector<16x32xf32>
    %108 = arith.maximumf %106, %107 : vector<16x32xf32>
    %c0_77 = arith.constant 0 : index
    %c0_78 = arith.constant 0 : index
    %c0_79 = arith.constant 0 : index
    %109 = vector.load %arg16[%c0_77, %c0_78, %c0_79] : memref<1x16x32xf32, #tpu.memory_space<vmem>>, vector<1x16x32xf32>
    %110 = vector.shape_cast %109 : vector<1x16x32xf32> to vector<16x32xf32>
    %111 = vector.shape_cast %108 : vector<16x32xf32> to vector<1x16x32xf32>
    tpu.vector_store %arg16[%c0_77, %c0_78, %c0_79], %111 {strides = array<i32>} : memref<1x16x32xf32, #tpu.memory_space<vmem>>, vector<1x16x32xf32>,
    return
  }
  func.func @transform_0(%arg0: i32) -> (i32, i32, i32) {
    %c0_i32 = arith.constant 0 : i32
    %c0_i32_0 = arith.constant 0 : i32
    %c0_i32_1 = arith.constant 0 : i32
    return %arg0, %c0_i32, %c0_i32_0 : i32, i32, i32
  }
  func.func @transform_1(%arg0: i32) -> (i32, i32, i32) {
    %c0_i32 = arith.constant 0 : i32
    %c0_i32_0 = arith.constant 0 : i32
    %c0_i32_1 = arith.constant 0 : i32
    return %arg0, %c0_i32, %c0_i32_0 : i32, i32, i32
  }
  func.func @transform_2(%arg0: i32) -> (i32, i32) {
    %c0_i32 = arith.constant 0 : i32
    %c0_i32_0 = arith.constant 0 : i32
    %c0_i32_1 = arith.constant 0 : i32
    return %c0_i32, %c0_i32_0 : i32, i32
  }
  func.func @transform_3(%arg0: i32) -> (i32, i32) {
    %c0_i32 = arith.constant 0 : i32
    %c0_i32_0 = arith.constant 0 : i32
    %c0_i32_1 = arith.constant 0 : i32
    return %c0_i32, %c0_i32_0 : i32, i32
  }
  func.func @transform_4(%arg0: i32) -> (i32, i32) {
    %c0_i32 = arith.constant 0 : i32
    %c0_i32_0 = arith.constant 0 : i32
    %c0_i32_1 = arith.constant 0 : i32
    return %c0_i32, %c0_i32_0 : i32, i32
  }
  func.func @transform_5(%arg0: i32) -> (i32, i32) {
    %c0_i32 = arith.constant 0 : i32
    %c0_i32_0 = arith.constant 0 : i32
    %c0_i32_1 = arith.constant 0 : i32
    return %c0_i32, %c0_i32_0 : i32, i32
  }
  func.func @transform_6(%arg0: i32) -> (i32, i32) {
    %c0_i32 = arith.constant 0 : i32
    %c0_i32_0 = arith.constant 0 : i32
    %c0_i32_1 = arith.constant 0 : i32
    return %c0_i32, %c0_i32_0 : i32, i32
  }
  func.func @transform_7(%arg0: i32) -> (i32, i32) {
    %c0_i32 = arith.constant 0 : i32
    %c0_i32_0 = arith.constant 0 : i32
    %c0_i32_1 = arith.constant 0 : i32
    return %c0_i32, %c0_i32_0 : i32, i32
  }
  func.func @transform_8(%arg0: i32) -> (i32, i32) {
    %c0_i32 = arith.constant 0 : i32
    %c0_i32_0 = arith.constant 0 : i32
    %c0_i32_1 = arith.constant 0 : i32
    return %c0_i32, %c0_i32_0 : i32, i32
  }
  func.func @transform_9(%arg0: i32) -> (i32, i32) {
    %c0_i32 = arith.constant 0 : i32
    %c0_i32_0 = arith.constant 0 : i32
    %c0_i32_1 = arith.constant 0 : i32
    return %c0_i32, %c0_i32_0 : i32, i32
  }
  func.func @transform_10(%arg0: i32) -> (i32, i32) {
    %c0_i32 = arith.constant 0 : i32
    %c0_i32_0 = arith.constant 0 : i32
    %c0_i32_1 = arith.constant 0 : i32
    return %c0_i32, %c0_i32_0 : i32, i32
  }
  func.func @transform_11(%arg0: i32) -> (i32, i32) {
    %c0_i32 = arith.constant 0 : i32
    %c0_i32_0 = arith.constant 0 : i32
    %c0_i32_1 = arith.constant 0 : i32
    return %c0_i32, %c0_i32_0 : i32, i32
  }
  func.func @transform_12(%arg0: i32) -> (i32, i32) {
    %c0_i32 = arith.constant 0 : i32
    %c0_i32_0 = arith.constant 0 : i32
    %c0_i32_1 = arith.constant 0 : i32
    return %c0_i32, %c0_i32_0 : i32, i32
  }
  func.func @transform_13(%arg0: i32) -> (i32, i32) {
    %c0_i32 = arith.constant 0 : i32
    %c0_i32_0 = arith.constant 0 : i32
    %c0_i32_1 = arith.constant 0 : i32
    return %c0_i32, %c0_i32_0 : i32, i32
  }
  func.func @transform_14(%arg0: i32) -> (i32, i32) {
    %c0_i32 = arith.constant 0 : i32
    %c0_i32_0 = arith.constant 0 : i32
    %c0_i32_1 = arith.constant 0 : i32
    return %c0_i32, %c0_i32_0 : i32, i32
  }
  func.func @transform_15(%arg0: i32) -> (i32, i32, i32) {
    %c0_i32 = arith.constant 0 : i32
    %c0_i32_0 = arith.constant 0 : i32
    %c0_i32_1 = arith.constant 0 : i32
    return %arg0, %c0_i32, %c0_i32_0 : i32, i32, i32
  }
}

module attributes {stable_mosaic.version = 11 : i64} {
  func.func @resnet_block_kernel(%arg0: i32, %arg1: memref<1x16x32xf32, #tpu.memory_space<vmem>>, %arg2: memref<1x16x1xf32, #tpu.memory_space<vmem>>, %arg3: memref<32x64xf32, #tpu.memory_space<vmem>>, %arg4: memref<96x32xf32, #tpu.memory_space<vmem>>, %arg5: memref<1x32xf32, #tpu.memory_space<vmem>>, %arg6: memref<1x32xf32, #tpu.memory_space<vmem>>, %arg7: memref<1x32xf32, #tpu.memory_space<vmem>>, %arg8: memref<4x32xf32, #tpu.memory_space<vmem>>, %arg9: memref<32x4xf32, #tpu.memory_space<vmem>>, %arg10: memref<96x64xf32, #tpu.memory_space<vmem>>, %arg11: memref<1x64xf32, #tpu.memory_space<vmem>>, %arg12: memref<1x64xf32, #tpu.memory_space<vmem>>, %arg13: memref<1x64xf32, #tpu.memory_space<vmem>>, %arg14: memref<4x64xf32, #tpu.memory_space<vmem>>, %arg15: memref<64x4xf32, #tpu.memory_space<vmem>>, %arg16: memref<1x16x64xf32, #tpu.memory_space<vmem>>, %arg17: memref<16x96xf32, #tpu.memory_space<vmem>>) attributes {dimension_semantics = [#tpu.dimension_semantics<parallel>], iteration_bounds = array<i64: 2>, scalar_prefetch = 0 : i64, scratch_operands = 1 : i64, tpu.core_type = #tpu.core_type<tc>, window_params = [{transform_indices = @transform_0, window_bounds = array<i64: 1, 16, 32>}, {transform_indices = @transform_1, window_bounds = array<i64: 1, 16, 1>}, {pipeline_mode = #tpu.pipeline_mode<synchronous>, transform_indices = @transform_2, window_bounds = array<i64: 32, 64>}, {pipeline_mode = #tpu.pipeline_mode<synchronous>, transform_indices = @transform_3, window_bounds = array<i64: 96, 32>}, {pipeline_mode = #tpu.pipeline_mode<synchronous>, transform_indices = @transform_4, window_bounds = array<i64: 1, 32>}, {pipeline_mode = #tpu.pipeline_mode<synchronous>, transform_indices = @transform_5, window_bounds = array<i64: 1, 32>}, {pipeline_mode = #tpu.pipeline_mode<synchronous>, transform_indices = @transform_6, window_bounds = array<i64: 1, 32>}, {pipeline_mode = #tpu.pipeline_mode<synchronous>, transform_indices = @transform_7, window_bounds = array<i64: 4, 32>}, {pipeline_mode = #tpu.pipeline_mode<synchronous>, transform_indices = @transform_8, window_bounds = array<i64: 32, 4>}, {pipeline_mode = #tpu.pipeline_mode<synchronous>, transform_indices = @transform_9, window_bounds = array<i64: 96, 64>}, {pipeline_mode = #tpu.pipeline_mode<synchronous>, transform_indices = @transform_10, window_bounds = array<i64: 1, 64>}, {pipeline_mode = #tpu.pipeline_mode<synchronous>, transform_indices = @transform_11, window_bounds = array<i64: 1, 64>}, {pipeline_mode = #tpu.pipeline_mode<synchronous>, transform_indices = @transform_12, window_bounds = array<i64: 1, 64>}, {pipeline_mode = #tpu.pipeline_mode<synchronous>, transform_indices = @transform_13, window_bounds = array<i64: 4, 64>}, {pipeline_mode = #tpu.pipeline_mode<synchronous>, transform_indices = @transform_14, window_bounds = array<i64: 64, 4>}, {transform_indices = @transform_15, window_bounds = array<i64: 1, 16, 64>}]} {
    %c0 = arith.constant 0 : index
    %c0_0 = arith.constant 0 : index
    %c0_1 = arith.constant 0 : index
    %0 = vector.load %arg2[%c0, %c0_0, %c0_1] : memref<1x16x1xf32, #tpu.memory_space<vmem>>, vector<1x16x1xf32>
    %1 = vector.shape_cast %0 : vector<1x16x1xf32> to vector<16x1xf32>
    %c0_2 = arith.constant 0 : index
    %c0_3 = arith.constant 0 : index
    %c0_4 = arith.constant 0 : index
    %2 = vector.load %arg1[%c0_2, %c0_3, %c0_4] : memref<1x16x32xf32, #tpu.memory_space<vmem>>, vector<1x16x32xf32>
    %3 = vector.shape_cast %2 : vector<1x16x32xf32> to vector<16x32xf32>
    %4 = vector.broadcast %1 : vector<16x1xf32> to vector<16x32xf32>
    %5 = arith.mulf %3, %4 : vector<16x32xf32>
    %c0_5 = arith.constant 0 : index
    %c0_6 = arith.constant 0 : index
    %6 = vector.load %arg3[%c0_5, %c0_6] : memref<32x64xf32, #tpu.memory_space<vmem>>, vector<32x64xf32>
    %cst = arith.constant dense<0.000000e+00> : vector<16x64xf32>
    %7 = tpu.matmul %5, %6, %cst {dimension_numbers = #tpu.dot_dimension_numbers<[1], [0], [0], [1], [0, 0, 1, 1], [], []>} : vector<16x32xf32>, vector<32x64xf32>, vector<16x64xf32> -> vector<16x64xf32>
    %8 = vector.broadcast %1 : vector<16x1xf32> to vector<16x64xf32>
    %9 = arith.mulf %7, %8 : vector<16x64xf32>
    %10 = vector.extract_strided_slice %5 {offsets = [0, 0], sizes = [15, 32], strides = [1, 1]} : vector<16x32xf32> to vector<15x32xf32>
    %c1 = arith.constant 1 : index
    %c0_7 = arith.constant 0 : index
    %11 = vector.load %arg17[%c1, %c0_7] : memref<16x96xf32, #tpu.memory_space<vmem>>, vector<15x32xf32>
    tpu.vector_store %arg17[%c1, %c0_7], %10 {strides = array<i32>} : memref<16x96xf32, #tpu.memory_space<vmem>>, vector<15x32xf32>,
    %cst_8 = arith.constant 0.000000e+00 : f32
    %12 = vector.broadcast %cst_8 : f32 to vector<1x32xf32>
    %c0_9 = arith.constant 0 : index
    %c0_10 = arith.constant 0 : index
    %13 = vector.load %arg17[%c0_9, %c0_10] : memref<16x96xf32, #tpu.memory_space<vmem>>, vector<1x32xf32>
    tpu.vector_store %arg17[%c0_9, %c0_10], %12 {strides = array<i32>} : memref<16x96xf32, #tpu.memory_space<vmem>>, vector<1x32xf32>,
    %c0_11 = arith.constant 0 : index
    %c32 = arith.constant 32 : index
    %14 = vector.load %arg17[%c0_11, %c32] : memref<16x96xf32, #tpu.memory_space<vmem>>, vector<16x32xf32>
    tpu.vector_store %arg17[%c0_11, %c32], %5 {strides = array<i32>} : memref<16x96xf32, #tpu.memory_space<vmem>>, vector<16x32xf32>,
    %15 = vector.extract_strided_slice %5 {offsets = [1, 0], sizes = [15, 32], strides = [1, 1]} : vector<16x32xf32> to vector<15x32xf32>
    %c0_12 = arith.constant 0 : index
    %c64 = arith.constant 64 : index
    %16 = vector.load %arg17[%c0_12, %c64] : memref<16x96xf32, #tpu.memory_space<vmem>>, vector<15x32xf32>
    tpu.vector_store %arg17[%c0_12, %c64], %15 {strides = array<i32>} : memref<16x96xf32, #tpu.memory_space<vmem>>, vector<15x32xf32>,
    %cst_13 = arith.constant 0.000000e+00 : f32
    %17 = vector.broadcast %cst_13 : f32 to vector<1x32xf32>
    %c15 = arith.constant 15 : index
    %c64_14 = arith.constant 64 : index
    %18 = vector.load %arg17[%c15, %c64_14] : memref<16x96xf32, #tpu.memory_space<vmem>>, vector<1x32xf32>
    tpu.vector_store %arg17[%c15, %c64_14], %17 {strides = array<i32>} : memref<16x96xf32, #tpu.memory_space<vmem>>, vector<1x32xf32>,
    %c0_15 = arith.constant 0 : index
    %c0_16 = arith.constant 0 : index
    %19 = vector.load %arg17[%c0_15, %c0_16] : memref<16x96xf32, #tpu.memory_space<vmem>>, vector<16x96xf32>
    %c0_17 = arith.constant 0 : index
    %c0_18 = arith.constant 0 : index
    %20 = vector.load %arg4[%c0_17, %c0_18] : memref<96x32xf32, #tpu.memory_space<vmem>>, vector<96x32xf32>
    %cst_19 = arith.constant dense<0.000000e+00> : vector<16x32xf32>
    %21 = tpu.matmul %19, %20, %cst_19 {dimension_numbers = #tpu.dot_dimension_numbers<[1], [0], [0], [1], [0, 0, 1, 1], [], []>} : vector<16x96xf32>, vector<96x32xf32>, vector<16x32xf32> -> vector<16x32xf32>
    %c0_20 = arith.constant 0 : index
    %c0_21 = arith.constant 0 : index
    %22 = vector.load %arg5[%c0_20, %c0_21] : memref<1x32xf32, #tpu.memory_space<vmem>>, vector<1x32xf32>
    %23 = vector.broadcast %22 : vector<1x32xf32> to vector<16x32xf32>
    %24 = arith.addf %21, %23 : vector<16x32xf32>
    %c0_22 = arith.constant 0 : index
    %c0_23 = arith.constant 0 : index
    %25 = vector.load %arg8[%c0_22, %c0_23] : memref<4x32xf32, #tpu.memory_space<vmem>>, vector<4x32xf32>
    %c0_24 = arith.constant 0 : index
    %c0_25 = arith.constant 0 : index
    %26 = vector.load %arg9[%c0_24, %c0_25] : memref<32x4xf32, #tpu.memory_space<vmem>>, vector<32x4xf32>
    %c0_26 = arith.constant 0 : index
    %c0_27 = arith.constant 0 : index
    %27 = vector.load %arg6[%c0_26, %c0_27] : memref<1x32xf32, #tpu.memory_space<vmem>>, vector<1x32xf32>
    %c0_28 = arith.constant 0 : index
    %c0_29 = arith.constant 0 : index
    %28 = vector.load %arg7[%c0_28, %c0_29] : memref<1x32xf32, #tpu.memory_space<vmem>>, vector<1x32xf32>
    %cst_30 = arith.constant dense<0.000000e+00> : vector<32xf32>
    %29 = vector.multi_reduction <add>, %24, %cst_30 [0] : vector<16x32xf32> to vector<32xf32>
    %30 = vector.shape_cast %29 : vector<32xf32> to vector<1x32xf32>
    %31 = arith.mulf %24, %24 : vector<16x32xf32>
    %cst_31 = arith.constant dense<0.000000e+00> : vector<32xf32>
    %32 = vector.multi_reduction <add>, %31, %cst_31 [0] : vector<16x32xf32> to vector<32xf32>
    %33 = vector.shape_cast %32 : vector<32xf32> to vector<1x32xf32>
    %cst_32 = arith.constant dense<0.000000e+00> : vector<1x4xf32>
    %34 = tpu.matmul %30, %26, %cst_32 {dimension_numbers = #tpu.dot_dimension_numbers<[1], [0], [0], [1], [0, 0, 1, 1], [], []>} : vector<1x32xf32>, vector<32x4xf32>, vector<1x4xf32> -> vector<1x4xf32>
    %cst_33 = arith.constant 7.812500e-03 : f32
    %35 = vector.broadcast %cst_33 : f32 to vector<1x4xf32>
    %36 = arith.mulf %34, %35 : vector<1x4xf32>
    %cst_34 = arith.constant dense<0.000000e+00> : vector<1x4xf32>
    %37 = tpu.matmul %33, %26, %cst_34 {dimension_numbers = #tpu.dot_dimension_numbers<[1], [0], [0], [1], [0, 0, 1, 1], [], []>} : vector<1x32xf32>, vector<32x4xf32>, vector<1x4xf32> -> vector<1x4xf32>
    %cst_35 = arith.constant 7.812500e-03 : f32
    %38 = vector.broadcast %cst_35 : f32 to vector<1x4xf32>
    %39 = arith.mulf %37, %38 : vector<1x4xf32>
    %40 = arith.mulf %36, %36 : vector<1x4xf32>
    %41 = arith.subf %39, %40 : vector<1x4xf32>
    %cst_36 = arith.constant 9.99999974E-6 : f32
    %42 = vector.broadcast %cst_36 : f32 to vector<1x4xf32>
    %43 = arith.addf %41, %42 : vector<1x4xf32>
    %44 = math.rsqrt %43 : vector<1x4xf32>
    %cst_37 = arith.constant dense<0.000000e+00> : vector<1x32xf32>
    %45 = tpu.matmul %36, %25, %cst_37 {dimension_numbers = #tpu.dot_dimension_numbers<[1], [0], [0], [1], [0, 0, 1, 1], [], []>} : vector<1x4xf32>, vector<4x32xf32>, vector<1x32xf32> -> vector<1x32xf32>
    %cst_38 = arith.constant dense<0.000000e+00> : vector<1x32xf32>
    %46 = tpu.matmul %44, %25, %cst_38 {dimension_numbers = #tpu.dot_dimension_numbers<[1], [0], [0], [1], [0, 0, 1, 1], [], []>} : vector<1x4xf32>, vector<4x32xf32>, vector<1x32xf32> -> vector<1x32xf32>
    %47 = vector.broadcast %45 : vector<1x32xf32> to vector<16x32xf32>
    %48 = arith.subf %24, %47 : vector<16x32xf32>
    %49 = vector.broadcast %46 : vector<1x32xf32> to vector<16x32xf32>
    %50 = arith.mulf %48, %49 : vector<16x32xf32>
    %51 = vector.broadcast %27 : vector<1x32xf32> to vector<16x32xf32>
    %52 = arith.mulf %50, %51 : vector<16x32xf32>
    %53 = vector.broadcast %28 : vector<1x32xf32> to vector<16x32xf32>
    %54 = arith.addf %52, %53 : vector<16x32xf32>
    %55 = vector.broadcast %1 : vector<16x1xf32> to vector<16x32xf32>
    %56 = arith.mulf %54, %55 : vector<16x32xf32>
    %cst_39 = arith.constant 0.000000e+00 : f32
    %57 = vector.broadcast %cst_39 : f32 to vector<16x32xf32>
    %58 = arith.maximumf %56, %57 : vector<16x32xf32>
    %59 = vector.extract_strided_slice %58 {offsets = [0, 0], sizes = [15, 32], strides = [1, 1]} : vector<16x32xf32> to vector<15x32xf32>
    %c1_40 = arith.constant 1 : index
    %c0_41 = arith.constant 0 : index
    %60 = vector.load %arg17[%c1_40, %c0_41] : memref<16x96xf32, #tpu.memory_space<vmem>>, vector<15x32xf32>
    tpu.vector_store %arg17[%c1_40, %c0_41], %59 {strides = array<i32>} : memref<16x96xf32, #tpu.memory_space<vmem>>, vector<15x32xf32>,
    %cst_42 = arith.constant 0.000000e+00 : f32
    %61 = vector.broadcast %cst_42 : f32 to vector<1x32xf32>
    %c0_43 = arith.constant 0 : index
    %c0_44 = arith.constant 0 : index
    %62 = vector.load %arg17[%c0_43, %c0_44] : memref<16x96xf32, #tpu.memory_space<vmem>>, vector<1x32xf32>
    tpu.vector_store %arg17[%c0_43, %c0_44], %61 {strides = array<i32>} : memref<16x96xf32, #tpu.memory_space<vmem>>, vector<1x32xf32>,
    %c0_45 = arith.constant 0 : index
    %c32_46 = arith.constant 32 : index
    %63 = vector.load %arg17[%c0_45, %c32_46] : memref<16x96xf32, #tpu.memory_space<vmem>>, vector<16x32xf32>
    tpu.vector_store %arg17[%c0_45, %c32_46], %58 {strides = array<i32>} : memref<16x96xf32, #tpu.memory_space<vmem>>, vector<16x32xf32>,
    %64 = vector.extract_strided_slice %58 {offsets = [1, 0], sizes = [15, 32], strides = [1, 1]} : vector<16x32xf32> to vector<15x32xf32>
    %c0_47 = arith.constant 0 : index
    %c64_48 = arith.constant 64 : index
    %65 = vector.load %arg17[%c0_47, %c64_48] : memref<16x96xf32, #tpu.memory_space<vmem>>, vector<15x32xf32>
    tpu.vector_store %arg17[%c0_47, %c64_48], %64 {strides = array<i32>} : memref<16x96xf32, #tpu.memory_space<vmem>>, vector<15x32xf32>,
    %cst_49 = arith.constant 0.000000e+00 : f32
    %66 = vector.broadcast %cst_49 : f32 to vector<1x32xf32>
    %c15_50 = arith.constant 15 : index
    %c64_51 = arith.constant 64 : index
    %67 = vector.load %arg17[%c15_50, %c64_51] : memref<16x96xf32, #tpu.memory_space<vmem>>, vector<1x32xf32>
    tpu.vector_store %arg17[%c15_50, %c64_51], %66 {strides = array<i32>} : memref<16x96xf32, #tpu.memory_space<vmem>>, vector<1x32xf32>,
    %c0_52 = arith.constant 0 : index
    %c0_53 = arith.constant 0 : index
    %68 = vector.load %arg17[%c0_52, %c0_53] : memref<16x96xf32, #tpu.memory_space<vmem>>, vector<16x96xf32>
    %c0_54 = arith.constant 0 : index
    %c0_55 = arith.constant 0 : index
    %69 = vector.load %arg10[%c0_54, %c0_55] : memref<96x64xf32, #tpu.memory_space<vmem>>, vector<96x64xf32>
    %cst_56 = arith.constant dense<0.000000e+00> : vector<16x64xf32>
    %70 = tpu.matmul %68, %69, %cst_56 {dimension_numbers = #tpu.dot_dimension_numbers<[1], [0], [0], [1], [0, 0, 1, 1], [], []>} : vector<16x96xf32>, vector<96x64xf32>, vector<16x64xf32> -> vector<16x64xf32>
    %c0_57 = arith.constant 0 : index
    %c0_58 = arith.constant 0 : index
    %71 = vector.load %arg11[%c0_57, %c0_58] : memref<1x64xf32, #tpu.memory_space<vmem>>, vector<1x64xf32>
    %72 = vector.broadcast %71 : vector<1x64xf32> to vector<16x64xf32>
    %73 = arith.addf %70, %72 : vector<16x64xf32>
    %c0_59 = arith.constant 0 : index
    %c0_60 = arith.constant 0 : index
    %74 = vector.load %arg14[%c0_59, %c0_60] : memref<4x64xf32, #tpu.memory_space<vmem>>, vector<4x64xf32>
    %c0_61 = arith.constant 0 : index
    %c0_62 = arith.constant 0 : index
    %75 = vector.load %arg15[%c0_61, %c0_62] : memref<64x4xf32, #tpu.memory_space<vmem>>, vector<64x4xf32>
    %c0_63 = arith.constant 0 : index
    %c0_64 = arith.constant 0 : index
    %76 = vector.load %arg12[%c0_63, %c0_64] : memref<1x64xf32, #tpu.memory_space<vmem>>, vector<1x64xf32>
    %c0_65 = arith.constant 0 : index
    %c0_66 = arith.constant 0 : index
    %77 = vector.load %arg13[%c0_65, %c0_66] : memref<1x64xf32, #tpu.memory_space<vmem>>, vector<1x64xf32>
    %cst_67 = arith.constant dense<0.000000e+00> : vector<64xf32>
    %78 = vector.multi_reduction <add>, %73, %cst_67 [0] : vector<16x64xf32> to vector<64xf32>
    %79 = vector.shape_cast %78 : vector<64xf32> to vector<1x64xf32>
    %80 = arith.mulf %73, %73 : vector<16x64xf32>
    %cst_68 = arith.constant dense<0.000000e+00> : vector<64xf32>
    %81 = vector.multi_reduction <add>, %80, %cst_68 [0] : vector<16x64xf32> to vector<64xf32>
    %82 = vector.shape_cast %81 : vector<64xf32> to vector<1x64xf32>
    %cst_69 = arith.constant dense<0.000000e+00> : vector<1x4xf32>
    %83 = tpu.matmul %79, %75, %cst_69 {dimension_numbers = #tpu.dot_dimension_numbers<[1], [0], [0], [1], [0, 0, 1, 1], [], []>} : vector<1x64xf32>, vector<64x4xf32>, vector<1x4xf32> -> vector<1x4xf32>
    %cst_70 = arith.constant 3.906250e-03 : f32
    %84 = vector.broadcast %cst_70 : f32 to vector<1x4xf32>
    %85 = arith.mulf %83, %84 : vector<1x4xf32>
    %cst_71 = arith.constant dense<0.000000e+00> : vector<1x4xf32>
    %86 = tpu.matmul %82, %75, %cst_71 {dimension_numbers = #tpu.dot_dimension_numbers<[1], [0], [0], [1], [0, 0, 1, 1], [], []>} : vector<1x64xf32>, vector<64x4xf32>, vector<1x4xf32> -> vector<1x4xf32>
    %cst_72 = arith.constant 3.906250e-03 : f32
    %87 = vector.broadcast %cst_72 : f32 to vector<1x4xf32>
    %88 = arith.mulf %86, %87 : vector<1x4xf32>
    %89 = arith.mulf %85, %85 : vector<1x4xf32>
    %90 = arith.subf %88, %89 : vector<1x4xf32>
    %cst_73 = arith.constant 9.99999974E-6 : f32
    %91 = vector.broadcast %cst_73 : f32 to vector<1x4xf32>
    %92 = arith.addf %90, %91 : vector<1x4xf32>
    %93 = math.rsqrt %92 : vector<1x4xf32>
    %cst_74 = arith.constant dense<0.000000e+00> : vector<1x64xf32>
    %94 = tpu.matmul %85, %74, %cst_74 {dimension_numbers = #tpu.dot_dimension_numbers<[1], [0], [0], [1], [0, 0, 1, 1], [], []>} : vector<1x4xf32>, vector<4x64xf32>, vector<1x64xf32> -> vector<1x64xf32>
    %cst_75 = arith.constant dense<0.000000e+00> : vector<1x64xf32>
    %95 = tpu.matmul %93, %74, %cst_75 {dimension_numbers = #tpu.dot_dimension_numbers<[1], [0], [0], [1], [0, 0, 1, 1], [], []>} : vector<1x4xf32>, vector<4x64xf32>, vector<1x64xf32> -> vector<1x64xf32>
    %96 = vector.broadcast %94 : vector<1x64xf32> to vector<16x64xf32>
    %97 = arith.subf %73, %96 : vector<16x64xf32>
    %98 = vector.broadcast %95 : vector<1x64xf32> to vector<16x64xf32>
    %99 = arith.mulf %97, %98 : vector<16x64xf32>
    %100 = vector.broadcast %76 : vector<1x64xf32> to vector<16x64xf32>
    %101 = arith.mulf %99, %100 : vector<16x64xf32>
    %102 = vector.broadcast %77 : vector<1x64xf32> to vector<16x64xf32>
    %103 = arith.addf %101, %102 : vector<16x64xf32>
    %104 = vector.broadcast %1 : vector<16x1xf32> to vector<16x64xf32>
    %105 = arith.mulf %103, %104 : vector<16x64xf32>
    %106 = arith.addf %9, %105 : vector<16x64xf32>
    %cst_76 = arith.constant 0.000000e+00 : f32
    %107 = vector.broadcast %cst_76 : f32 to vector<16x64xf32>
    %108 = arith.maximumf %106, %107 : vector<16x64xf32>
    %c0_77 = arith.constant 0 : index
    %c0_78 = arith.constant 0 : index
    %c0_79 = arith.constant 0 : index
    %109 = vector.load %arg16[%c0_77, %c0_78, %c0_79] : memref<1x16x64xf32, #tpu.memory_space<vmem>>, vector<1x16x64xf32>
    %110 = vector.shape_cast %109 : vector<1x16x64xf32> to vector<16x64xf32>
    %111 = vector.shape_cast %108 : vector<16x64xf32> to vector<1x16x64xf32>
    tpu.vector_store %arg16[%c0_77, %c0_78, %c0_79], %111 {strides = array<i32>} : memref<1x16x64xf32, #tpu.memory_space<vmem>>, vector<1x16x64xf32>,
    return
  }
  func.func @transform_0(%arg0: i32) -> (i32, i32, i32) {
    %c0_i32 = arith.constant 0 : i32
    %c0_i32_0 = arith.constant 0 : i32
    %c0_i32_1 = arith.constant 0 : i32
    return %arg0, %c0_i32, %c0_i32_0 : i32, i32, i32
  }
  func.func @transform_1(%arg0: i32) -> (i32, i32, i32) {
    %c0_i32 = arith.constant 0 : i32
    %c0_i32_0 = arith.constant 0 : i32
    %c0_i32_1 = arith.constant 0 : i32
    return %arg0, %c0_i32, %c0_i32_0 : i32, i32, i32
  }
  func.func @transform_2(%arg0: i32) -> (i32, i32) {
    %c0_i32 = arith.constant 0 : i32
    %c0_i32_0 = arith.constant 0 : i32
    %c0_i32_1 = arith.constant 0 : i32
    return %c0_i32, %c0_i32_0 : i32, i32
  }
  func.func @transform_3(%arg0: i32) -> (i32, i32) {
    %c0_i32 = arith.constant 0 : i32
    %c0_i32_0 = arith.constant 0 : i32
    %c0_i32_1 = arith.constant 0 : i32
    return %c0_i32, %c0_i32_0 : i32, i32
  }
  func.func @transform_4(%arg0: i32) -> (i32, i32) {
    %c0_i32 = arith.constant 0 : i32
    %c0_i32_0 = arith.constant 0 : i32
    %c0_i32_1 = arith.constant 0 : i32
    return %c0_i32, %c0_i32_0 : i32, i32
  }
  func.func @transform_5(%arg0: i32) -> (i32, i32) {
    %c0_i32 = arith.constant 0 : i32
    %c0_i32_0 = arith.constant 0 : i32
    %c0_i32_1 = arith.constant 0 : i32
    return %c0_i32, %c0_i32_0 : i32, i32
  }
  func.func @transform_6(%arg0: i32) -> (i32, i32) {
    %c0_i32 = arith.constant 0 : i32
    %c0_i32_0 = arith.constant 0 : i32
    %c0_i32_1 = arith.constant 0 : i32
    return %c0_i32, %c0_i32_0 : i32, i32
  }
  func.func @transform_7(%arg0: i32) -> (i32, i32) {
    %c0_i32 = arith.constant 0 : i32
    %c0_i32_0 = arith.constant 0 : i32
    %c0_i32_1 = arith.constant 0 : i32
    return %c0_i32, %c0_i32_0 : i32, i32
  }
  func.func @transform_8(%arg0: i32) -> (i32, i32) {
    %c0_i32 = arith.constant 0 : i32
    %c0_i32_0 = arith.constant 0 : i32
    %c0_i32_1 = arith.constant 0 : i32
    return %c0_i32, %c0_i32_0 : i32, i32
  }
  func.func @transform_9(%arg0: i32) -> (i32, i32) {
    %c0_i32 = arith.constant 0 : i32
    %c0_i32_0 = arith.constant 0 : i32
    %c0_i32_1 = arith.constant 0 : i32
    return %c0_i32, %c0_i32_0 : i32, i32
  }
  func.func @transform_10(%arg0: i32) -> (i32, i32) {
    %c0_i32 = arith.constant 0 : i32
    %c0_i32_0 = arith.constant 0 : i32
    %c0_i32_1 = arith.constant 0 : i32
    return %c0_i32, %c0_i32_0 : i32, i32
  }
  func.func @transform_11(%arg0: i32) -> (i32, i32) {
    %c0_i32 = arith.constant 0 : i32
    %c0_i32_0 = arith.constant 0 : i32
    %c0_i32_1 = arith.constant 0 : i32
    return %c0_i32, %c0_i32_0 : i32, i32
  }
  func.func @transform_12(%arg0: i32) -> (i32, i32) {
    %c0_i32 = arith.constant 0 : i32
    %c0_i32_0 = arith.constant 0 : i32
    %c0_i32_1 = arith.constant 0 : i32
    return %c0_i32, %c0_i32_0 : i32, i32
  }
  func.func @transform_13(%arg0: i32) -> (i32, i32) {
    %c0_i32 = arith.constant 0 : i32
    %c0_i32_0 = arith.constant 0 : i32
    %c0_i32_1 = arith.constant 0 : i32
    return %c0_i32, %c0_i32_0 : i32, i32
  }
  func.func @transform_14(%arg0: i32) -> (i32, i32) {
    %c0_i32 = arith.constant 0 : i32
    %c0_i32_0 = arith.constant 0 : i32
    %c0_i32_1 = arith.constant 0 : i32
    return %c0_i32, %c0_i32_0 : i32, i32
  }
  func.func @transform_15(%arg0: i32) -> (i32, i32, i32) {
    %c0_i32 = arith.constant 0 : i32
    %c0_i32_0 = arith.constant 0 : i32
    %c0_i32_1 = arith.constant 0 : i32
    return %arg0, %c0_i32, %c0_i32_0 : i32, i32, i32
  }
}

</mosaic_0001>

<bundles_post_ra>
// kernel: shallow_resnet1d_forward.3
= control target key start
LH: loop header
LB: loop body
LE: loop exit
PB: predicated region body
PF: predicated region fallthrough
CT: control target
= control target key end

     0   :  { %s904_s13 = smov 0   ;;  %s1019_s0 = inlined_call_operand.vmem [shape: f32[2,16,8], index: 0, kind: input, shape index: {}]   ;;  %s1020_s1 = inlined_call_operand.vmem [shape: f32[2,16,1], index: 1, kind: input, shape index: {}]   ;;  %s1021_s2 = inlined_call_operand.vmem [shape: f32[56,32], index: 2, kind: input, shape index: {}]   ;;  %s1022_s3 = inlined_call_operand.vmem [shape: f32[1,32], index: 3, kind: input, shape index: {}]   ;;  %s1023_s4 = inlined_call_operand.vmem [shape: f32[1,32], index: 4, kind: input, shape index: {}]   ;;  %s1024_s5 = inlined_call_operand.vmem [shape: f32[1,32], index: 5, kind: input, shape index: {}]   ;;  %s1025_s6 = inlined_call_operand.vmem [shape: f32[4,32], index: 6, kind: input, shape index: {}]   ;;  %s1026_s7 = inlined_call_operand.vmem [shape: f32[32,4], index: 7, kind: input, shape index: {}]   ;;  %s1027_s8 = inlined_call_operand.vmem [shape: f32[32,32], index: 8, kind: input, shape index: {}]   ;;  %s1028_s9 = inlined_call_operand.vmem [shape: f32[1,32], index: 9, kind: input, shape index: {}]   ;;  %s1029_s10 = inlined_call_operand.vmem [shape: f32[2,16,32], index: 10, kind: output, shape index: {}]  }
   0x1 LB: > { %s784_s14 = sadd.s32 4294967295, %s839_s13   ;;  %p788_p0 = scmp.ge.s32.totalorder %s839_s13, 1  ;;  %s839_s13 = sphi %s904_s13, %s20_s13  }
   0x2   : > { %p322_p1 = scmp.lt.s32.totalorder %s839_s13, 3 }
   0x4   : > { %p323_p2 = pnand %p788_p0, %p322_p1 }
   0x5   : > { %p365_p3 = scmp.lt.s32.totalorder (!%p323_p2), %s784_s14, 1  ;;  %s842_s22 = smov (!%p323_p2), 24  }
   0x6   : > { %326 = sbr.rel (%p323_p2) target bundleno = 886 (0x376), region = 60  ;;  %s843_s23 = smov (!%p323_p2), 16  }
   0x7   : > { %s844_s24 = smov (!%p323_p2), 8   ;;  %s845_s25 = smov (!%p323_p2), 32  }
   0x8   : > { %s846_s26 = smov (!%p323_p2), 48   ;;  %s847_s27 = smov (!%p323_p2), 40  }
   0xb   : > { %v841_v0 = vmov 0   ;;  %s1031_s14 = smov (!%p365_p3, %s784_s14), 1  ;;  %vm396_vm0 = vcmask 64512   ;;  %vm398_vm1 = vcmask 61440   ;;  %vm400_vm2 = vcmask 59392   ;;  %v481_v12 = vld [vmem:[%s1021_s2 + $0x30] sm:$0xff] }
   0xc   : > { %826 = vset.pattern.permute.xlu0 %v841_v0  ;;  %s912_s15 = sshll.u32 %s1031_s14, 4  ;;  %vm414_vm3 = vcmask 123968   ;;  %v848_v9 = vmov 0.0   ;;  %vm426_vm4 = vcmask 188544   ;;  %v480_v13 = vld [vmem:[%s1021_s2 + $0x28] sm:$0xff]  ;;  %502 = vmatpush.msra.mxu0 %v481_v12  ;;  %v479_v14 = vld [vmem:[%s1021_s2 + $0x20] sm:$0xff] }
   0xd   : > { %s374_s18 = scalar_lea.vmem %s1020_s1, %s912_s15  ;;  %s369_s21 = scalar_lea.vmem %s1019_s0, %s912_s15  ;;  %401 = vst.msk [vmem:[#allocation2] sm:$0x7] %vm400_vm2, %v848_v9  ;;  %vm410_vm5 = vcmask 130112   ;;  %vm422_vm6 = vcmask 195712   ;;  %vm434_vm7 = vcmask 261312   ;;  %vm443_vm8 = vcmask 326913  }
   0xe   : > { %v380_v1 = vld [vmem:[%s374_s18] sm:$0xff]  ;;  %v381_v2 = vld [vmem:[%s374_s18 + $0x8] sm:$0xff]  ;;  %415 = vst.msk [vmem:[#allocation2] sm:$0x3] %vm414_vm3, %v848_v9  ;;  %503 = vmatpush.msra.mxu0 %v480_v13  ;;  %v478_v16 = vld [vmem:[%s1021_s2 + $0x18] sm:$0xff]  ;;  %vm412_vm9 = vcmask 128064   ;;  %s379_s16 = scalar_lea.vmem %s1029_s10, %s912_s15 }
   0xf   : > { %386 = vperm.xlu0 %826, %v380_v1   ;;  %v382_v3 = vld [vmem:[%s369_s21] sm:$0xff]  ;;  %v383_v6 = vld [vmem:[%s369_s21 + $0x8] sm:$0xff]  ;;  %427 = vst.msk [vmem:[#allocation2] sm:$0x1] %vm426_vm4, %v848_v9  ;;  %v477_v17 = vld [vmem:[%s1021_s2 + $0x10] sm:$0xff]  ;;  %vm424_vm10 = vcmask 194688  }
  0x10   : > { %504 = vmatpush.msra.mxu0 %v479_v14  ;;  %v476_v20 = vld [vmem:[%s1021_s2 + $0x8] sm:$0xff]  ;;  %v475_v21 = vld [vmem:[%s1021_s2] sm:$0xff]  ;;  %vm447_vm11 = vcmask 319744   ;;  %vm445_vm12 = vcmask 326912   ;;  %vm459_vm13 = vcmask 386368   ;;  %vm457_vm14 = vcmask 392512  }
  0x11   : > { %vm471_vm15 = vcmask 452992   ;;  %vm469_vm2 = vcmask 458112   ;;  %vm486_vm3 = vcmask 457728   ;;  %v522_v31 = vld [vmem:[%s1026_s7 + $0x18] sm:$0xff]  ;;  %v521_v32 = vld [vmem:[%s1026_s7 + $0x10] sm:$0xff]  ;;  %v520_v33 = vld [vmem:[%s1026_s7 + $0x8] sm:$0xff] }
  0x12   : > { %505 = vmatpush.msra.mxu0 %v478_v16  ;;  %561 = vmatpush.msra.mxu2 %v522_v31  ;;  %v519_v34 = vld [vmem:[%s1026_s7] sm:$0xff]  ;;  %vm525_vm4 = vcmask 261120   ;;  %v678_v16 = vld [vmem:[%s1027_s8 + $0x10] sm:$0xff] }
  0x13   : > { %v827_v35 = vld [vmem:[%s1022_s3] ss:$0 sm:$0xff] }
  0x14   : > { %506 = vmatpush.msra.mxu0 %v477_v17  ;;  %562 = vmatpush.msra.mxu2 %v521_v32  ;;  %v518_v62 = vld [vmem:[%s1025_s6] sm:$0xf]  ;;  %v677_v17 = vld [vmem:[%s1027_s8 + $0x8] sm:$0xff] }
  0x16   : > { %507 = vmatpush.msra.mxu0 %v476_v20  ;;  %563 = vmatpush.msra.mxu2 %v520_v33 }
  0x17   : > { %391 = vperm.xlu0 %826, %v381_v2  }
  0x18   : > { %508 = vmatpush.msra.mxu0 %v475_v21  ;;  %564 = vmatpush.msra.mxu2 %v519_v34 }
  0x1a   : > { %585 = vmatpush.msrb.mxu2 %v522_v31 }
  0x1c   : > { %586 = vmatpush.msrb.mxu2 %v521_v32 }
  0x1e   : > { %587 = vmatpush.msrb.mxu2 %v520_v33 }
  0x20   : > { %588 = vmatpush.msrb.mxu2 %v519_v34 }
  0x81   : > { %v922_v4 = vpop.permute.xlu0 %386 }
  0x82   : > { %v394_v5 = vmul.f32 %v922_v4, %v382_v3 }
  0x84   : > { %428 = vrot.lane.b32.xlu0 %v394_v5, %s842_s22  ;;  %416 = vrot.lane.b32.xlu2 %v394_v5, %s843_s23  ;;  %397 = vst.msk [vmem:[#allocation2 + $0x3] sm:$0xff] %vm396_vm0, %v394_v5  ;;  %vm455_vm0 = vcmask 392514  }
  0x85   : > { %404 = vrot.lane.b32.xlu1 %v394_v5, %s844_s24 }
  0x89   : > { %v925_v7 = vpop.permute.xlu0 %391 }
  0x8a   : > { %v395_v8 = vmul.f32 %v925_v7, %v383_v6 }
  0x8c   : > { %439 = vrot.lane.b32.xlu0 %v395_v8, %s845_s25  ;;  %418 = vrot.lane.b32.xlu2 %v395_v8, %s843_s23  ;;  %399 = vst.msk [vmem:[#allocation2 + $0xb] sm:$0x1f] %vm398_vm1, %v395_v8  ;;  %vm467_vm1 = vcmask 458115  }
  0x8d   : > { %406 = vrot.lane.b32.xlu1 %v395_v8, %s844_s24 }
  0x94   : > { %461 = vrot.lane.b32.xlu0 %v394_v5, %s846_s26  ;;  %437 = vrot.lane.b32.xlu2 %v394_v5, %s845_s25 }
  0x95   : > { %430 = vrot.lane.b32.xlu1 %v395_v8, %s842_s22 }
  0x9c   : > { %451 = vrot.lane.b32.xlu2 %v395_v8, %s847_s27 }
  0x9d   : > { %449 = vrot.lane.b32.xlu1 %v394_v5, %s847_s27 }
  0xa5   : > { %463 = vrot.lane.b32.xlu1 %v395_v8, %s846_s26 }
  0xde   : > { %v417_v10 = vpop.permute.xlu2 %416 }
  0xe6   : > { %v419_v11 = vpop.permute.xlu2 %418 }
  0xee   : > { %v438_v19 = vpop.permute.xlu2 %437 }
  0xf6   : > { %v429_v18 = vpop.permute.xlu0 %428  ;;  %v452_v25 = vpop.permute.xlu2 %451 }
  0xf7   : > { %v405_v15 = vpop.permute.xlu1 %404 }
  0xf8   : > { %411 = vst.msk [vmem:[#allocation2 + $0x2] sm:$0xff] %vm410_vm5, %v405_v15  ;;  %vm611_vm5 = vcmask 1043456   ;;  %v679_v15 = vld [vmem:[%s1027_s8 + $0x18] sm:$0xff] }
  0xf9   : > { %423 = vst.msk [vmem:[#allocation2 + $0x1] sm:$0xff] %vm422_vm6, %v417_v10  ;;  %799 = vmatpush.msk.msra.mxu3 %vm611_vm5, %v518_v62  ;;  %vm607_vm6 = vcmask 31744   ;;  %702 = vmatpush.msra.mxu1 %v679_v15 }
  0xfa   : > { %435 = vst.msk [vmem:[#allocation2] sm:$0xff] %vm434_vm7, %v429_v18  ;;  %v676_v18 = vld [vmem:[%s1027_s8] sm:$0xff] }
  0xfb   : > { %444 = vst.msk [vmem:[#allocation2 - $0x1] sm:$0xfe] %vm443_vm8, %v438_v19  ;;  %801 = vmatpush.msk.msrb.mxu3 %vm611_vm5, %v518_v62  ;;  %703 = vmatpush.msra.mxu1 %v678_v16 }
  0xfd   : > { %704 = vmatpush.msra.mxu1 %v677_v17 }
  0xfe   : > { %v440_v23 = vpop.permute.xlu0 %439 }
  0xff   : > { %v407_v22 = vpop.permute.xlu1 %406  ;;  %705 = vmatpush.msra.mxu1 %v676_v18 }
 0x100   : > { %413 = vst.msk [vmem:[#allocation2 + $0xa] sm:$0x3f] %vm412_vm9, %v407_v22 }
 0x101   : > { %425 = vst.msk [vmem:[#allocation2 + $0x9] sm:$0x7f] %vm424_vm10, %v419_v11 }
 0x106   : > { %v462_v27 = vpop.permute.xlu0 %461 }
 0x107   : > { %v431_v24 = vpop.permute.xlu1 %430 }
 0x108   : > { %436 = vst.msk [vmem:[#allocation2 + $0x8] sm:$0xff] %vm434_vm7, %v431_v24  ;;  %v828_v24 = vld [vmem:[%s1023_s4] ss:$0 sm:$0xff] }
 0x109   : > { %448 = vst.msk [vmem:[#allocation2 + $0xf] sm:$0x1] %vm447_vm11, %v848_v9 }
 0x10a   : > { %446 = vst.msk [vmem:[#allocation2 + $0x7] sm:$0xff] %vm445_vm12, %v440_v23 }
 0x10b   : > { %460 = vst.msk [vmem:[#allocation2 + $0xe] sm:$0x3] %vm459_vm13, %v848_v9 }
 0x10c   : > { %458 = vst.msk [vmem:[#allocation2 + $0x6] sm:$0xff] %vm457_vm14, %v452_v25 }
 0x10d   : > { %472 = vst.msk [vmem:[#allocation2 + $0xd] sm:$0x7] %vm471_vm15, %v848_v9 }
 0x10f   : > { %v450_v26 = vpop.permute.xlu1 %449 }
 0x110   : > { %456 = vst.msk [vmem:[#allocation2 - $0x2] sm:$0xfc] %vm455_vm0, %v450_v26 }
 0x111   : > { %468 = vst.msk [vmem:[#allocation2 - $0x3] sm:$0xf8] %vm467_vm1, %v462_v27  ;;  %v829_v27 = vld [vmem:[%s1024_s5] ss:$0 sm:$0xff] }
 0x117   : > { %v464_v28 = vpop.permute.xlu1 %463 }
 0x118   : > { %470 = vst.msk [vmem:[#allocation2 + $0x5] sm:$0xff] %vm469_vm2, %v464_v28 }
 0x11f   : > { %v473_v29 = vld [vmem:[#allocation2] sm:$0xff]  ;;  %v474_v30 = vld [vmem:[#allocation2 + $0x8] sm:$0xff] }
 0x120   : > { %795 = vmatmul.msk.f32.vlgmr.msra.gmra.mxu0 %vm486_vm3, %v473_v29 }
 0x128   : > { %796 = vmatmul.msk.f32.gmra.mxu0 %vm486_vm3, %v474_v30 }
 0x19d   : > { %v510_v36 = vpop.f32.mrf.mxu0 }
 0x19e   : > { %v511_v37 = vadd.f32 %v827_v35, %v510_v36 }
 0x1a0   : > { %v967_v38 = vmul.f32 %v511_v37, %v922_v4 }
 0x1a2   : > { %v535_v41 = vmul.f32 %v967_v38, %v967_v38  ;;  %v526_v43 = vsel %vm525_vm4, %v967_v38, 0.0 }
 0x1a4   : > { %v537_v47 = vsel %vm525_vm4, %v535_v41, 0.0 }
 0x1a5   : > { %v513_v39 = vpop.f32.mrf.mxu0 }
 0x1a6   : > { %v514_v40 = vadd.f32 %v827_v35, %v513_v39  ;;  %v830_v35 = vld [vmem:[%s1028_s9] ss:$0 sm:$0xff] }
 0x1a8   : > { %v517_v42 = vmul.f32 %v514_v40, %v925_v7 }
 0x1aa   : > { %v527_v44 = vsel %vm525_vm4, %v517_v42, 0.0  ;;  %v536_v45 = vmul.f32 %v517_v42, %v517_v42 }
 0x1ab   : > { %v528_v46 = vadd.f32 %v527_v44, %v526_v43 }
 0x1ac   : > { %v538_v48 = vsel %vm525_vm4, %v536_v45, 0.0 }
 0x1ad   : > { %v539_v49 = vadd.f32 %v538_v48, %v537_v47  ;;  %v529_v50 = vrot.slane %v528_v46, 4 }
 0x1af   : > { %v540_v51 = vrot.slane %v539_v49, 4  ;;  %v530_v52 = vadd.f32 %v529_v50, %v528_v46 }
 0x1b1   : > { %v531_v53 = vrot.slane %v530_v52, 2  ;;  %v541_v54 = vadd.f32 %v540_v51, %v539_v49 }
 0x1b3   : > { %v532_v55 = vadd.f32 %v531_v53, %v530_v52  ;;  %v542_v56 = vrot.slane %v541_v54, 2 }
 0x1b5   : > { %v533_v57 = vrot.slane %v532_v55, 1  ;;  %v543_v59 = vadd.f32 %v542_v56, %v541_v54 }
 0x1b7   : > { %v534_v58 = vadd.f32 %v533_v57, %v532_v55  ;;  %v544_v60 = vrot.slane %v543_v59, 1 }
 0x1b9   : > { %797 = vmatmul.msk.f32.vlgmr.msra.gmra.mxu2 %vm525_vm4, %v534_v58  ;;  %v545_v61 = vadd.f32 %v544_v60, %v543_v59 }
 0x1c1   : > { %798 = vmatmul.msk.f32.vlgmr.msrb.gmra.mxu2 %vm525_vm4, %v545_v61 }
 0x23c   : > { %v566_v63 = vpop.f32.mrf.mxu2 }
 0x23d   : > { %v569_v0 = vmul.f32 0.0078125, %v566_v63 }
 0x23f   : > { %800 = vmatmul.msk.f32.vlgmr.msra.gmra.mxu3 %vm607_vm6, %v569_v0  ;;  %v594_v2 = vmul.f32 %v569_v0, %v569_v0 }
 0x244   : > { %v590_v1 = vpop.f32.mrf.mxu2 }
 0x245   : > { %v593_v3 = vmul.f32 0.0078125, %v590_v1 }
 0x247   : > { %v595_v5 = vsub.f32 %v593_v3, %v594_v2 }
 0x249   : > { %v596_v6 = vadd.f32 1e-05, %v595_v5 }
 0x24b   : > { %831 = vrsqrt.f32 %v596_v6  ;;  %vm603_vm8 = vweird.f32 %v596_v6 }
 0x251   : > { %v832_v8 = vpop.eup %831 }
 0x252   : > { %v598_v9 = vmul.f32 %v832_v8, %v596_v6  ;;  %vm604_vm7 = vweird.f32 %v832_v8 }
 0x253   : > { %vm605_vm9 = vmor %vm603_vm8, %vm604_vm7 }
 0x254   : > { %v599_v10 = vmul.f32 %v832_v8, %v598_v9 }
 0x256   : > { %v600_v11 = vmul.f32 0.5, %v599_v10 }
 0x258   : > { %v601_v12 = vsub.f32 1.5, %v600_v11 }
 0x25a   : > { %v602_v13 = vmul.f32 %v832_v8, %v601_v12 }
 0x25c   : > { %v606_v14 = vsel %vm605_vm9, %v832_v8, %v602_v13 }
 0x25d   : > { %802 = vmatmul.msk.f32.vlgmr.msrb.gmra.mxu3 %vm607_vm6, %v606_v14 }
 0x2c2   : > { %v632_v19 = vpop.f32.mrf.mxu3 }
 0x2c3   : > { %v658_v20 = vperm.slane %v632_v19, 0 }
 0x2c5   : > { %v659_v22 = vsub.f32 %v967_v38, %v658_v20  ;;  %v660_v25 = vsub.f32 %v517_v42, %v658_v20 }
 0x2e0   : > { %v655_v21 = vpop.f32.mrf.mxu3 }
 0x2e1   : > { %v661_v23 = vperm.slane %v655_v21, 0 }
 0x2e3   : > { %v662_v26 = vmul.f32 %v661_v23, %v659_v22  ;;  %v663_v28 = vmul.f32 %v661_v23, %v660_v25 }
 0x2e5   : > { %v667_v29 = vmul.f32 %v828_v24, %v662_v26  ;;  %v668_v31 = vmul.f32 %v828_v24, %v663_v28 }
 0x2e7   : > { %v672_v30 = vadd.f32 %v829_v27, %v667_v29  ;;  %v673_v33 = vadd.f32 %v829_v27, %v668_v31 }
 0x2e9   : > { %v674_v32 = vmax.f32 %v672_v30, 0.0  ;;  %v675_v34 = vmax.f32 %v673_v33, 0.0 }
 0x2eb   : > { %803 = vmatmul.msk.f32.vlgmr.msra.gmra.mxu1 %vm525_vm4, %v674_v32 }
 0x2f3   : > { %804 = vmatmul.msk.f32.gmra.mxu1 %vm525_vm4, %v675_v34 }
 0x368   : > { %v707_v36 = vpop.f32.mrf.mxu1 }
 0x369   : > { %v708_v37 = vadd.f32 %v830_v35, %v707_v36 }
 0x36b   : > { %v713_v38 = vmul.f32 %v708_v37, %v922_v4 }
 0x36d   : > { %715 = vst.msk [vmem:[%s379_s16] sm:$0xff] %vm525_vm4, %v713_v38 }
 0x370   : > { %v710_v39 = vpop.f32.mrf.mxu1 }
 0x371   : > { %v711_v40 = vadd.f32 %v830_v35, %v710_v39 }
 0x373   : > { %v714_v41 = vmul.f32 %v711_v40, %v925_v7 }
 0x375   : > { %716 = vst.msk [vmem:[%s379_s16 + $0x8] sm:$0xff] %vm525_vm4, %v714_v41 }
 0x376 PF: > { %s20_s13 = sadd.s32 1, %s839_s13  }
 0x377   : > { %p17_p4 = scmp.ge.s32.totalorder %s20_s13, 4  }
 0x379   :  { %19 = sbr.rel (!%p17_p4) target bundleno = 1 (0x1), region = 93 }

// kernel: shallow_resnet1d_forward.4
= control target key start
LH: loop header
LB: loop body
LE: loop exit
PB: predicated region body
PF: predicated region fallthrough
CT: control target
= control target key end

     0   :  { %20 = vsyncpa [#allocation4], 0  ;;  %s1579_s0 = inlined_call_operand.vmem [shape: f32[2,16,32], index: 0, kind: input, shape index: {}]   ;;  %s1580_s1 = inlined_call_operand.vmem [shape: f32[2,16,1], index: 1, kind: input, shape index: {}]   ;;  %s1581_s2 = inlined_call_operand.vmem [shape: f32[32,32], index: 2, kind: input, shape index: {}]   ;;  %s1582_s3 = inlined_call_operand.hbm [shape: f32[96,32], index: 3, kind: input, shape index: {}]   ;;  %s1583_s4 = inlined_call_operand.vmem [shape: f32[1,32], index: 4, kind: input, shape index: {}]   ;;  %s1584_s5 = inlined_call_operand.vmem [shape: f32[1,32], index: 5, kind: input, shape index: {}]   ;;  %s1585_s6 = inlined_call_operand.vmem [shape: f32[1,32], index: 6, kind: input, shape index: {}]   ;;  %s1586_s7 = inlined_call_operand.vmem [shape: f32[4,32], index: 7, kind: input, shape index: {}]   ;;  %s1587_s8 = inlined_call_operand.vmem [shape: f32[32,4], index: 8, kind: input, shape index: {}]   ;;  %s1588_s9 = inlined_call_operand.hbm [shape: f32[96,32], index: 9, kind: input, shape index: {}]   ;;  %s1589_s10 = inlined_call_operand.vmem [shape: f32[1,32], index: 10, kind: input, shape index: {}]   ;;  %s1590_s11 = inlined_call_operand.vmem [shape: f32[1,32], index: 11, kind: input, shape index: {}]   ;;  %s1591_s12 = inlined_call_operand.vmem [shape: f32[1,32], index: 12, kind: input, shape index: {}]   ;;  %s1592_s13 = inlined_call_operand.vmem [shape: f32[4,32], index: 13, kind: input, shape index: {}]   ;;  %s1593_s14 = inlined_call_operand.vmem [shape: f32[32,4], index: 14, kind: input, shape index: {}]   ;;  %s1594_s15 = inlined_call_operand.vmem [shape: f32[2,16,32], index: 15, kind: output, shape index: {}]  }
   0x1   :  { %21 = vsyncpa [#allocation6], 0  ;;  %s1401_s18 = smov 0  }
   0x2 LB: > { %s397_s21 = sshll.u32 %s1582_s3, 4  ;;  %s1153_s22 = sadd.s32 4294967295, %s1311_s18   ;;  %s1311_s18 = sphi %s1401_s18, %s27_s18   ;;  %s398_s21 = int_to_ptr.hbm [resolvable:$true] %s397_s21 }
   0x3   : > { %p1155_p0 = scmp.ge.s32.totalorder %s1311_s18, 1  ;;  %p383_p1 = scmp.lt.s32.totalorder %s1311_s18, 3 }
   0x4   : > { %p1206_p2 = scmp.eq.s32.totalorder %s1153_s22, 0  ;;  %s1313_s24 = smov [#allocation3]  }
   0x5   : > { %p1412_p3 = pnand %p1155_p0, %p383_p1  ;;  %s399_s25 = sshll.u32 %s1313_s24, 4  ;;  %s400_s25 = int_to_ptr.vmem [resolvable:$true] %s399_s25 }
   0x6   : > { %s426_s28 = sshll.u32 %s1588_s9, 4  ;;  %s1314_s29 = smov [#allocation5]   ;;  %s427_s28 = int_to_ptr.hbm [resolvable:$true] %s426_s28 }
   0x7   : > { %p1199_p4 = pneg %p1412_p3  ;;  %s428_s30 = sshll.u32 %s1314_s29, 4  ;;  %s429_s30 = int_to_ptr.vmem [resolvable:$true] %s428_s30 }
   0x8   : > { %s1315_s16 = smov 128   ;;  %s1316_s17 = smov 8  }
   0x9   : > { %p1200_p5 = pnand %p1206_p2, %p1199_p4  ;;  %475 = sbr.rel (%p1412_p3) target bundleno = 1314 (0x522), region = 80 }
   0xb   : > { %1202 = dma.hbm_to_vmem [thread:$0]  (!%p1200_p5), %s398_s21, 1536, %s400_s25, [#allocation4], %s1315_s16, %s1315_s16, %s1316_s17  }
   0xc   : > { %1205 = dma.hbm_to_vmem [thread:$0]  (!%p1200_p5), %s427_s28, 1536, %s429_s30, [#allocation6], %s1315_s16, %s1315_s16, %s1316_s17  }
   0xe   : > { %1302 = dma.done.wait (%p1206_p2), [#allocation4], 1536  }
   0xf   : > { %1304 = vsyncadd (%p1206_p2), [#allocation4], 4294965760 }
  0x10   : > { %1306 = dma.done.wait (%p1206_p2), [#allocation6], 1536  }
  0x11   : > { %1308 = vsyncadd (%p1206_p2), [#allocation6], 4294965760  ;;  %p534_p6 = scmp.lt.s32.totalorder %s1153_s22, 1  ;;  %v1317_v0 = vmov 0   ;;  %v568_v2 = vld [vmem:[%s1581_s2 + $0x18] sm:$0xff]  ;;  %v567_v3 = vld [vmem:[%s1581_s2 + $0x10] sm:$0xff] }
  0x12   : > { %1226 = vset.pattern.permute.xlu0 %v1317_v0  ;;  %588 = vmatpush.msra.mxu0 %v568_v2  ;;  %v566_v4 = vld [vmem:[%s1581_s2 + $0x8] sm:$0xff]  ;;  %v565_v6 = vld [vmem:[%s1581_s2] sm:$0xff]  ;;  %vm569_vm0 = vcmask 261120   ;;  %s1318_s21 = smov 64   ;;  %vm602_vm1 = vcmask 260096   ;;  %vm604_vm2 = vcmask 253952  }
  0x13   : > { %s1597_s22 = smov (!%p534_p6, %s1153_s22), 1  ;;  %v640_v13 = vld [vmem:[#allocation3 + $0x58] sm:$0xff]  ;;  %v639_v14 = vld [vmem:[#allocation3 + $0x50] sm:$0xff]  ;;  %v1320_v15 = vmov 0.0   ;;  %v638_v16 = vld [vmem:[#allocation3 + $0x48] sm:$0xff]  ;;  %vm612_vm3 = vcmask 523520  }
  0x14   : > { %s1428_s19 = sshll.u32 %s1597_s22, 4  ;;  %589 = vmatpush.msra.mxu0 %v567_v3  ;;  %656 = vmatpush.msra.mxu1 %v640_v13  ;;  %605 = vst.msk [vmem:[#allocation2] sm:$0x1] %vm604_vm2, %v1320_v15  ;;  %v637_v17 = vld [vmem:[#allocation3 + $0x40] sm:$0xff]  ;;  %v636_v18 = vld [vmem:[#allocation3 + $0x38] sm:$0xff]  ;;  %v635_v19 = vld [vmem:[#allocation3 + $0x30] sm:$0xff] }
  0x15   : > { %s543_s23 = scalar_lea.vmem %s1580_s1, %s1428_s19  ;;  %s538_s20 = scalar_lea.vmem %s1579_s0, %s1428_s19  ;;  %v634_v20 = vld [vmem:[#allocation3 + $0x28] sm:$0xff]  ;;  %v633_v21 = vld [vmem:[#allocation3 + $0x20] sm:$0xff]  ;;  %v632_v22 = vld [vmem:[#allocation3 + $0x18] sm:$0xff]  ;;  %vm621_vm4 = vcmask 785921   ;;  %vm623_vm5 = vcmask 785920   ;;  %vm625_vm6 = vcmask 778752  }
  0x16   : > { %v549_v1 = vld [vmem:[%s543_s23] sm:$0xff]  ;;  %590 = vmatpush.msra.mxu0 %v566_v4  ;;  %v550_v5 = vld [vmem:[%s543_s23 + $0x8] sm:$0xff]  ;;  %s1319_s23 = smov 32   ;;  %657 = vmatpush.msra.mxu1 %v639_v14  ;;  %v630_v24 = vld [vmem:[#allocation3 + $0x8] sm:$0xff]  ;;  %vm645_vm7 = vcmask 785408   ;;  %vm767_vm8 = vcmask 1043456   ;;  %s548_s16 = scalar_lea.vmem %s1594_s15, %s1428_s19 }
  0x17   : > { %555 = vperm.xlu0 %1226, %v549_v1   ;;  %v551_v7 = vld [vmem:[%s538_s20] sm:$0xff]  ;;  %v552_v10 = vld [vmem:[%s538_s20 + $0x8] sm:$0xff]  ;;  %v629_v25 = vld [vmem:[#allocation3] sm:$0xff]  ;;  %vm763_vm9 = vcmask 31744  }
  0x18   : > { %591 = vmatpush.msra.mxu0 %v565_v6  ;;  %658 = vmatpush.msra.mxu1 %v638_v16  ;;  %v631_v23 = vld [vmem:[#allocation3 + $0x10] sm:$0xff]  ;;  %v679_v32 = vld [vmem:[%s1587_s8 + $0x18] sm:$0xff]  ;;  %v678_v33 = vld [vmem:[%s1587_s8 + $0x10] sm:$0xff] }
  0x19   : > { %717 = vmatpush.msra.mxu2 %v679_v32  ;;  %741 = vmatpush.msra.mxu3 %v679_v32  ;;  %v677_v34 = vld [vmem:[%s1587_s8 + $0x8] sm:$0xff]  ;;  %v676_v35 = vld [vmem:[%s1587_s8] sm:$0xff] }
  0x1a   : > { %659 = vmatpush.msra.mxu1 %v637_v17  ;;  %v1227_v37 = vld [vmem:[%s1583_s4] ss:$0 sm:$0xff] }
  0x1b   : > { %718 = vmatpush.msra.mxu2 %v678_v33  ;;  %742 = vmatpush.msra.mxu3 %v678_v33  ;;  %v675_v61 = vld [vmem:[%s1586_s7] sm:$0xf]  ;;  %v869_v33 = vld [vmem:[#allocation5 + $0x58] sm:$0xff] }
  0x1c   : > { %660 = vmatpush.msra.mxu1 %v636_v18  ;;  %884 = vmatpush.msrb.mxu0 %v869_v33 }
  0x1d   : > { %719 = vmatpush.msra.mxu2 %v677_v34  ;;  %743 = vmatpush.msra.mxu3 %v677_v34  ;;  %v868_v34 = vld [vmem:[#allocation5 + $0x50] sm:$0xff] }
  0x1e   : > { %661 = vmatpush.msra.mxu1 %v635_v19  ;;  %885 = vmatpush.msrb.mxu0 %v868_v34 }
  0x1f   : > { %560 = vperm.xlu0 %1226, %v550_v5   ;;  %720 = vmatpush.msra.mxu2 %v676_v35 }
  0x20   : > { %662 = vmatpush.msra.mxu1 %v634_v20  ;;  %744 = vmatpush.msra.mxu3 %v676_v35  ;;  %v867_v35 = vld [vmem:[#allocation5 + $0x48] sm:$0xff] }
  0x21   : > { %1174 = vmatpush.msk.msrb.mxu2 %vm767_vm8, %v675_v61  ;;  %886 = vmatpush.msrb.mxu0 %v867_v35 }
  0x22   : > { %663 = vmatpush.msra.mxu1 %v633_v21  ;;  %1176 = vmatpush.msk.msrb.mxu3 %vm767_vm8, %v675_v61  ;;  %v1228_v21 = vld [vmem:[%s1584_s5] ss:$0 sm:$0xff] }
  0x24   : > { %664 = vmatpush.msra.mxu1 %v632_v22 }
  0x26   : > { %665 = vmatpush.msra.mxu1 %v631_v23 }
  0x28   : > { %666 = vmatpush.msra.mxu1 %v630_v24  ;;  %v1229_v24 = vld [vmem:[%s1585_s6] ss:$0 sm:$0xff] }
  0x2a   : > { %667 = vmatpush.msra.mxu1 %v629_v25 }
  0x89   : > { %v1450_v8 = vpop.permute.xlu0 %555 }
  0x8a   : > { %v563_v9 = vmul.f32 %v1450_v8, %v551_v7 }
  0x8c   : > { %615 = vrot.lane.b32.xlu2 %v563_v9, %s1318_s21  ;;  %606 = vrot.lane.b32.xlu1 %v563_v9, %s1319_s23  ;;  %601 = vst.msk [vmem:[#allocation2 + $0x1] sm:$0xff] %vm569_vm0, %v563_v9 }
  0x8d   : > { %1168 = vmatmul.msk.f32.vlgmr.msra.gmra.mxu0 %vm569_vm0, %v563_v9 }
  0x91   : > { %v1457_v11 = vpop.permute.xlu0 %560 }
  0x92   : > { %v564_v12 = vmul.f32 %v1457_v11, %v552_v10 }
  0x94   : > { %617 = vrot.lane.b32.xlu2 %v564_v12, %s1318_s21  ;;  %608 = vrot.lane.b32.xlu1 %v564_v12, %s1319_s23  ;;  %603 = vst.msk [vmem:[#allocation2 + $0x9] sm:$0x7f] %vm602_vm1, %v564_v12 }
  0x95   : > { %1169 = vmatmul.msk.f32.gmra.mxu0 %vm569_vm0, %v564_v12 }
  0xe6   : > { %v616_v26 = vpop.permute.xlu2 %615 }
  0xee   : > { %v618_v29 = vpop.permute.xlu2 %617 }
  0xfe   : > { %v607_v27 = vpop.permute.xlu1 %606 }
  0xff   : > { %613 = vst.msk [vmem:[#allocation2] sm:$0xff] %vm612_vm3, %v607_v27 }
 0x100   : > { %622 = vst.msk [vmem:[#allocation2 - $0x1] sm:$0xfe] %vm621_vm4, %v616_v26 }
 0x106   : > { %v609_v28 = vpop.permute.xlu1 %608 }
 0x107   : > { %614 = vst.msk [vmem:[#allocation2 + $0x8] sm:$0xff] %vm612_vm3, %v609_v28 }
 0x108   : > { %624 = vst.msk [vmem:[#allocation2 + $0x7] sm:$0xff] %vm623_vm5, %v618_v29 }
 0x109   : > { %626 = vst.msk [vmem:[#allocation2 + $0xf] sm:$0x1] %vm625_vm6, %v1320_v15 }
 0x10f   : > { %v627_v30 = vld [vmem:[#allocation2] sm:$0xff] }
 0x110   : > { %1170 = vmatmul.msk.f32.vlgmr.msra.gmra.mxu1 %vm645_vm7, %v627_v30  ;;  %836 = vst.msk [vmem:[#allocation2] sm:$0x1] %vm604_vm2, %v1320_v15  ;;  %v628_v31 = vld [vmem:[#allocation2 + $0x8] sm:$0xff] }
 0x118   : > { %1171 = vmatmul.msk.f32.gmra.mxu1 %vm645_vm7, %v628_v31 }
 0x18d   : > { %v669_v36 = vpop.f32.mrf.mxu1 }
 0x18e   : > { %v670_v38 = vadd.f32 %v1227_v37, %v669_v36  ;;  %v866_v36 = vld [vmem:[#allocation5 + $0x40] sm:$0xff] }
 0x18f   : > { %887 = vmatpush.msrb.mxu0 %v866_v36 }
 0x190   : > { %v691_v40 = vmul.f32 %v670_v38, %v670_v38  ;;  %v682_v42 = vsel %vm569_vm0, %v670_v38, 0.0 }
 0x192   : > { %v693_v46 = vsel %vm569_vm0, %v691_v40, 0.0  ;;  %v862_v40 = vld [vmem:[#allocation5 + $0x20] sm:$0xff] }
 0x195   : > { %v672_v39 = vpop.f32.mrf.mxu1 }
 0x196   : > { %v673_v41 = vadd.f32 %v1227_v37, %v672_v39  ;;  %v865_v37 = vld [vmem:[#allocation5 + $0x38] sm:$0xff]  ;;  %v863_v39 = vld [vmem:[#allocation5 + $0x28] sm:$0xff] }
 0x197   : > { %888 = vmatpush.msrb.mxu0 %v865_v37 }
 0x198   : > { %v683_v43 = vsel %vm569_vm0, %v673_v41, 0.0  ;;  %v692_v44 = vmul.f32 %v673_v41, %v673_v41 }
 0x199   : > { %v684_v45 = vadd.f32 %v683_v43, %v682_v42  ;;  %v860_v42 = vld [vmem:[#allocation5 + $0x10] sm:$0xff]  ;;  %v859_v43 = vld [vmem:[#allocation5 + $0x8] sm:$0xff] }
 0x19a   : > { %v694_v47 = vsel %vm569_vm0, %v692_v44, 0.0  ;;  %v858_v44 = vld [vmem:[#allocation5] sm:$0xff] }
 0x19b   : > { %v685_v48 = vrot.slane %v684_v45, 4  ;;  %v695_v49 = vadd.f32 %v694_v47, %v693_v46 }
 0x19d   : > { %v686_v50 = vadd.f32 %v685_v48, %v684_v45  ;;  %v696_v51 = vrot.slane %v695_v49, 4 }
 0x19f   : > { %v687_v52 = vrot.slane %v686_v50, 2  ;;  %v697_v53 = vadd.f32 %v696_v51, %v695_v49  ;;  %v1526_v51 = vpop.f32.mrf.mxu0 }
 0x1a1   : > { %v688_v54 = vadd.f32 %v687_v52, %v686_v50  ;;  %v698_v55 = vrot.slane %v697_v53, 2  ;;  %v906_v52 = vld [vmem:[%s1593_s14 + $0x10] sm:$0xff] }
 0x1a3   : > { %v689_v56 = vrot.slane %v688_v54, 1  ;;  %v699_v57 = vadd.f32 %v698_v55, %v697_v53  ;;  %v905_v53 = vld [vmem:[%s1593_s14 + $0x8] sm:$0xff] }
 0x1a5   : > { %v690_v58 = vadd.f32 %v689_v56, %v688_v54  ;;  %v700_v59 = vrot.slane %v699_v57, 1  ;;  %v904_v54 = vld [vmem:[%s1593_s14] sm:$0xff] }
 0x1a7   : > { %1172 = vmatmul.msk.f32.vlgmr.msra.gmra.mxu2 %vm569_vm0, %v690_v58  ;;  %v701_v60 = vadd.f32 %v700_v59, %v699_v57  ;;  %v1540_v55 = vpop.f32.mrf.mxu0  ;;  %v1230_v57 = vld [vmem:[%s1589_s10] ss:$0 sm:$0xff] }
 0x1a9   : > { %1173 = vmatmul.msk.f32.vlgmr.msra.gmra.mxu3 %vm569_vm0, %v701_v60 }
 0x22a   : > { %v722_v62 = vpop.f32.mrf.mxu2 }
 0x22b   : > { %v725_v63 = vmul.f32 0.0078125, %v722_v62 }
 0x22c   : > { %v746_v0 = vpop.f32.mrf.mxu3 }
 0x22d   : > { %v750_v1 = vmul.f32 %v725_v63, %v725_v63  ;;  %v749_v2 = vmul.f32 0.0078125, %v746_v0  ;;  %1175 = vmatmul.msk.f32.vlgmr.msrb.gmra.mxu2 %vm763_vm9, %v725_v63 }
 0x22f   : > { %v751_v3 = vsub.f32 %v749_v2, %v750_v1 }
 0x231   : > { %v752_v4 = vadd.f32 1e-05, %v751_v3 }
 0x233   : > { %1233 = vrsqrt.f32 %v752_v4  ;;  %vm759_vm11 = vweird.f32 %v752_v4 }
 0x239   : > { %v1234_v5 = vpop.eup %1233 }
 0x23a   : > { %v754_v6 = vmul.f32 %v1234_v5, %v752_v4  ;;  %vm760_vm10 = vweird.f32 %v1234_v5 }
 0x23b   : > { %vm761_vm12 = vmor %vm759_vm11, %vm760_vm10 }
 0x23c   : > { %v755_v7 = vmul.f32 %v1234_v5, %v754_v6 }
 0x23e   : > { %v756_v9 = vmul.f32 0.5, %v755_v7 }
 0x240   : > { %v757_v10 = vsub.f32 1.5, %v756_v9 }
 0x242   : > { %v758_v12 = vmul.f32 %v1234_v5, %v757_v10 }
 0x244   : > { %v762_v13 = vsel %vm761_vm12, %v1234_v5, %v758_v12 }
 0x245   : > { %1177 = vmatmul.msk.f32.vlgmr.msrb.gmra.mxu3 %vm763_vm9, %v762_v13 }
 0x2b0   : > { %v788_v14 = vpop.f32.mrf.mxu2 }
 0x2b1   : > { %v814_v16 = vperm.slane %v788_v14, 0 }
 0x2b3   : > { %v815_v18 = vsub.f32 %v670_v38, %v814_v16  ;;  %v816_v19 = vsub.f32 %v673_v41, %v814_v16  ;;  %v864_v38 = vld [vmem:[#allocation5 + $0x30] sm:$0xff]  ;;  %v861_v41 = vld [vmem:[#allocation5 + $0x18] sm:$0xff] }
 0x2b4   : > { %889 = vmatpush.msrb.mxu0 %v864_v38 }
 0x2b6   : > { %890 = vmatpush.msrb.mxu0 %v863_v39 }
 0x2b8   : > { %891 = vmatpush.msrb.mxu0 %v862_v40 }
 0x2ba   : > { %892 = vmatpush.msrb.mxu0 %v861_v41  ;;  %v1231_v41 = vld [vmem:[%s1590_s11] ss:$0 sm:$0xff] }
 0x2bc   : > { %893 = vmatpush.msrb.mxu0 %v860_v42 }
 0x2be   : > { %894 = vmatpush.msrb.mxu0 %v859_v43 }
 0x2c0   : > { %895 = vmatpush.msrb.mxu0 %v858_v44  ;;  %v1232_v44 = vld [vmem:[%s1591_s12] ss:$0 sm:$0xff] }
 0x2c8   : > { %v811_v17 = vpop.f32.mrf.mxu3 }
 0x2c9   : > { %v817_v20 = vperm.slane %v811_v17, 0 }
 0x2cb   : > { %v818_v22 = vmul.f32 %v817_v20, %v815_v18  ;;  %v819_v23 = vmul.f32 %v817_v20, %v816_v19  ;;  %v903_v20 = vld [vmem:[%s1592_s13] sm:$0xf] }
 0x2cd   : > { %v823_v25 = vmul.f32 %v1228_v21, %v818_v22  ;;  %v824_v26 = vmul.f32 %v1228_v21, %v819_v23 }
 0x2cf   : > { %v829_v27 = vadd.f32 %v1229_v24, %v824_v26  ;;  %v828_v28 = vadd.f32 %v1229_v24, %v823_v25 }
 0x2d1   : > { %v831_v29 = vmul.f32 %v829_v27, %v1457_v11  ;;  %v830_v30 = vmul.f32 %v828_v28, %v1450_v8 }
 0x2d3   : > { %v833_v31 = vmax.f32 %v831_v29, 0.0  ;;  %v832_v32 = vmax.f32 %v830_v30, 0.0 }
 0x2d5   : > { %841 = vrot.lane.b32.xlu1 %v833_v31, %s1319_s23  ;;  %835 = vst.msk [vmem:[#allocation2 + $0x9] sm:$0x7f] %vm602_vm1, %v833_v31  ;;  %847 = vrot.lane.b32.xlu2 %v832_v32, %s1318_s21 }
 0x2d6   : > { %834 = vst.msk [vmem:[#allocation2 + $0x1] sm:$0xff] %vm569_vm0, %v832_v32  ;;  %839 = vrot.lane.b32.xlu0 %v832_v32, %s1319_s23 }
 0x2de   : > { %849 = vrot.lane.b32.xlu0 %v833_v31, %s1318_s21 }
 0x32f   : > { %v848_v47 = vpop.permute.xlu2 %847 }
 0x347   : > { %v842_v45 = vpop.permute.xlu1 %841 }
 0x348   : > { %846 = vst.msk [vmem:[#allocation2 + $0x8] sm:$0xff] %vm612_vm3, %v842_v45  ;;  %v840_v46 = vpop.permute.xlu0 %839 }
 0x349   : > { %855 = vst.msk [vmem:[#allocation2 + $0xf] sm:$0x1] %vm625_vm6, %v1320_v15  ;;  %v907_v15 = vld [vmem:[%s1593_s14 + $0x18] sm:$0xff] }
 0x34a   : > { %845 = vst.msk [vmem:[#allocation2] sm:$0xff] %vm612_vm3, %v840_v46  ;;  %945 = vmatpush.msra.mxu2 %v907_v15  ;;  %969 = vmatpush.msra.mxu3 %v907_v15 }
 0x34b   : > { %853 = vst.msk [vmem:[#allocation2 - $0x1] sm:$0xfe] %vm621_vm4, %v848_v47 }
 0x34c   : > { %946 = vmatpush.msra.mxu2 %v906_v52  ;;  %970 = vmatpush.msra.mxu3 %v906_v52 }
 0x34e   : > { %947 = vmatpush.msra.mxu2 %v905_v53  ;;  %971 = vmatpush.msra.mxu3 %v905_v53 }
 0x350   : > { %v850_v48 = vpop.permute.xlu0 %849  ;;  %948 = vmatpush.msra.mxu2 %v904_v54  ;;  %972 = vmatpush.msra.mxu3 %v904_v54 }
 0x351   : > { %854 = vst.msk [vmem:[#allocation2 + $0x7] sm:$0xff] %vm623_vm5, %v850_v48 }
 0x352   : > { %1182 = vmatpush.msk.msrb.mxu2 %vm767_vm8, %v903_v20  ;;  %1184 = vmatpush.msk.msrb.mxu3 %vm767_vm8, %v903_v20 }
 0x358   : > { %v856_v49 = vld [vmem:[#allocation2] sm:$0xff]  ;;  %v857_v50 = vld [vmem:[#allocation2 + $0x8] sm:$0xff] }
 0x359   : > { %1178 = vmatmul.msk.f32.vlgmr.msrb.gmra.mxu0 %vm645_vm7, %v856_v49  ;;  %v599_v49 = vmul.f32 %v1526_v51, %v1450_v8 }
 0x361   : > { %1179 = vmatmul.msk.f32.gmra.mxu0 %vm645_vm7, %v857_v50  ;;  %v600_v50 = vmul.f32 %v1540_v55, %v1457_v11 }
 0x3d6   : > { %v897_v56 = vpop.f32.mrf.mxu0 }
 0x3d7   : > { %v898_v58 = vadd.f32 %v1230_v57, %v897_v56 }
 0x3d9   : > { %v919_v60 = vmul.f32 %v898_v58, %v898_v58  ;;  %v910_v62 = vsel %vm569_vm0, %v898_v58, 0.0 }
 0x3db   : > { %v921_v2 = vsel %vm569_vm0, %v919_v60, 0.0 }
 0x3de   : > { %v900_v59 = vpop.f32.mrf.mxu0 }
 0x3df   : > { %v901_v61 = vadd.f32 %v1230_v57, %v900_v59 }
 0x3e1   : > { %v911_v63 = vsel %vm569_vm0, %v901_v61, 0.0  ;;  %v920_v0 = vmul.f32 %v901_v61, %v901_v61 }
 0x3e2   : > { %v912_v1 = vadd.f32 %v911_v63, %v910_v62 }
 0x3e3   : > { %v922_v3 = vsel %vm569_vm0, %v920_v0, 0.0 }
 0x3e4   : > { %v913_v4 = vrot.slane %v912_v1, 4  ;;  %v923_v5 = vadd.f32 %v922_v3, %v921_v2 }
 0x3e6   : > { %v914_v6 = vadd.f32 %v913_v4, %v912_v1  ;;  %v924_v7 = vrot.slane %v923_v5, 4 }
 0x3e8   : > { %v915_v9 = vrot.slane %v914_v6, 2  ;;  %v925_v10 = vadd.f32 %v924_v7, %v923_v5 }
 0x3ea   : > { %v916_v12 = vadd.f32 %v915_v9, %v914_v6  ;;  %v926_v13 = vrot.slane %v925_v10, 2 }
 0x3ec   : > { %v917_v14 = vrot.slane %v916_v12, 1  ;;  %v927_v16 = vadd.f32 %v926_v13, %v925_v10 }
 0x3ee   : > { %v918_v17 = vadd.f32 %v917_v14, %v916_v12  ;;  %v928_v18 = vrot.slane %v927_v16, 1 }
 0x3f0   : > { %1180 = vmatmul.msk.f32.vlgmr.msra.gmra.mxu2 %vm569_vm0, %v918_v17  ;;  %v929_v19 = vadd.f32 %v928_v18, %v927_v16 }
 0x3f2   : > { %1181 = vmatmul.msk.f32.vlgmr.msra.gmra.mxu3 %vm569_vm0, %v929_v19 }
 0x473   : > { %v950_v21 = vpop.f32.mrf.mxu2 }
 0x474   : > { %v953_v22 = vmul.f32 0.0078125, %v950_v21 }
 0x475   : > { %v974_v23 = vpop.f32.mrf.mxu3 }
 0x476   : > { %v978_v24 = vmul.f32 %v953_v22, %v953_v22  ;;  %v977_v25 = vmul.f32 0.0078125, %v974_v23  ;;  %1183 = vmatmul.msk.f32.vlgmr.msrb.gmra.mxu2 %vm763_vm9, %v953_v22 }
 0x478   : > { %v979_v26 = vsub.f32 %v977_v25, %v978_v24 }
 0x47a   : > { %v980_v27 = vadd.f32 1e-05, %v979_v26 }
 0x47c   : > { %1235 = vrsqrt.f32 %v980_v27  ;;  %vm987_vm14 = vweird.f32 %v980_v27 }
 0x482   : > { %v1236_v28 = vpop.eup %1235 }
 0x483   : > { %v982_v29 = vmul.f32 %v1236_v28, %v980_v27  ;;  %vm988_vm13 = vweird.f32 %v1236_v28 }
 0x484   : > { %vm989_vm15 = vmor %vm987_vm14, %vm988_vm13 }
 0x485   : > { %v983_v30 = vmul.f32 %v1236_v28, %v982_v29 }
 0x487   : > { %v984_v31 = vmul.f32 0.5, %v983_v30 }
 0x489   : > { %v985_v32 = vsub.f32 1.5, %v984_v31 }
 0x48b   : > { %v986_v33 = vmul.f32 %v1236_v28, %v985_v32 }
 0x48d   : > { %v990_v34 = vsel %vm989_vm15, %v1236_v28, %v986_v33 }
 0x48e   : > { %1185 = vmatmul.msk.f32.vlgmr.msrb.gmra.mxu3 %vm763_vm9, %v990_v34 }
 0x4f9   : > { %v1014_v35 = vpop.f32.mrf.mxu2 }
 0x4fa   : > { %v1040_v36 = vperm.slane %v1014_v35, 0 }
 0x4fc   : > { %v1041_v38 = vsub.f32 %v898_v58, %v1040_v36  ;;  %v1042_v39 = vsub.f32 %v901_v61, %v1040_v36 }
 0x511   : > { %v1037_v37 = vpop.f32.mrf.mxu3 }
 0x512   : > { %v1043_v40 = vperm.slane %v1037_v37, 0 }
 0x514   : > { %v1044_v42 = vmul.f32 %v1043_v40, %v1041_v38  ;;  %v1045_v43 = vmul.f32 %v1043_v40, %v1042_v39 }
 0x516   : > { %v1049_v45 = vmul.f32 %v1231_v41, %v1044_v42  ;;  %v1050_v46 = vmul.f32 %v1231_v41, %v1045_v43 }
 0x518   : > { %v1054_v47 = vadd.f32 %v1232_v44, %v1049_v45  ;;  %v1055_v48 = vadd.f32 %v1232_v44, %v1050_v46 }
 0x51a   : > { %v1056_v15 = vmul.f32 %v1054_v47, %v1450_v8  ;;  %v1057_v52 = vmul.f32 %v1055_v48, %v1457_v11 }
 0x51c   : > { %v1058_v53 = vadd.f32 %v1056_v15, %v599_v49  ;;  %v1059_v54 = vadd.f32 %v1057_v52, %v600_v50 }
 0x51e   : > { %v1060_v56 = vmax.f32 %v1058_v53, 0.0  ;;  %v1061_v57 = vmax.f32 %v1059_v54, 0.0 }
 0x520   : > { %1062 = vst.msk [vmem:[%s548_s16] sm:$0xff] %vm569_vm0, %v1060_v56 }
 0x521   : > { %1063 = vst.msk [vmem:[%s548_s16 + $0x8] sm:$0xff] %vm569_vm0, %v1061_v57 }
 0x522 PF: > { %s27_s18 = sadd.s32 1, %s1311_s18  }
 0x523   : > { %p24_p7 = scmp.ge.s32.totalorder %s27_s18, 4  }
 0x525   :  { %26 = sbr.rel (!%p24_p7) target bundleno = 2 (0x2), region = 122 }
 0x52a   :  { %1085 = vsyncpa [#allocation4], 1 }
 0x52b   :  { %1087 = vsyncpa [#allocation4 + $0x1], 1 }
 0x52c   :  { %1088 = vsyncpa [#allocation6], 1 }

// kernel: shallow_resnet1d_forward.5
= control target key start
LH: loop header
LB: loop body
LE: loop exit
PB: predicated region body
PF: predicated region fallthrough
CT: control target
= control target key end

     0   :  { %s1725_s0 = inlined_call_operand.vmem [shape: f32[2,16,32], index: 0, kind: input, shape index: {}]   ;;  %s1726_s1 = inlined_call_operand.vmem [shape: f32[2,16,1], index: 1, kind: input, shape index: {}]   ;;  %s1727_s2 = inlined_call_operand.vmem [shape: f32[32,64], index: 2, kind: input, shape index: {}]   ;;  %s1728_s3 = inlined_call_operand.vmem [shape: f32[96,32], index: 3, kind: input, shape index: {}]   ;;  %s1729_s4 = inlined_call_operand.vmem [shape: f32[1,32], index: 4, kind: input, shape index: {}]   ;;  %s1730_s5 = inlined_call_operand.vmem [shape: f32[1,32], index: 5, kind: input, shape index: {}]   ;;  %s1731_s6 = inlined_call_operand.vmem [shape: f32[1,32], index: 6, kind: input, shape index: {}]   ;;  %s1732_s7 = inlined_call_operand.vmem [shape: f32[4,32], index: 7, kind: input, shape index: {}]   ;;  %s1733_s8 = inlined_call_operand.vmem [shape: f32[32,4], index: 8, kind: input, shape index: {}]   ;;  %s1734_s9 = inlined_call_operand.hbm [shape: f32[96,64], index: 9, kind: input, shape index: {}]   ;;  %s1735_s10 = inlined_call_operand.vmem [shape: f32[1,64], index: 10, kind: input, shape index: {}]   ;;  %s1736_s11 = inlined_call_operand.vmem [shape: f32[1,64], index: 11, kind: input, shape index: {}]   ;;  %s1737_s12 = inlined_call_operand.vmem [shape: f32[1,64], index: 12, kind: input, shape index: {}]   ;;  %s1738_s13 = inlined_call_operand.vmem [shape: f32[4,64], index: 13, kind: input, shape index: {}]   ;;  %s1739_s14 = inlined_call_operand.vmem [shape: f32[64,4], index: 14, kind: input, shape index: {}]   ;;  %s1740_s15 = inlined_call_operand.hbm [shape: f32[2,16,64], index: 15, kind: output, shape index: {}]  }
   0x1   :  { %1747 = sst [smem:[#allocation13_spill]] %s1725_s0 }
   0x2   :  { %1748 = sst [smem:[#allocation14_spill]] %s1734_s9 }
   0x3   :  { %20 = vsyncpa [#allocation4], 0 }
   0x4   :  { %21 = vsyncpa [#allocation5], 0 }
   0x5   :  { %23 = vsyncpa [#allocation5 + $0x1], 0  ;;  %s1445_s18 = smov 0   ;;  %s1447_s19 = smov 0  }
   0x6   :  { %s1449_s20 = smov 0   ;;  %s1451_s21 = smov 0  }
   0x7 LB: > { %1749 = sst [smem:[#allocation9_spill]] %s1350_s20  ;;  %s1466_s22 = sadd.s32 4294967295, %s1354_s21   ;;  %s1354_s21 = sphi %s1451_s21, %s1759_s21   ;;  %s1350_s20 = sphi %s1449_s20, %s1761_s20   ;;  %s1346_s19 = sphi %s1447_s19, %s1763_s19   ;;  %s1342_s18 = sphi %s1445_s18, %s1762_s18  }
   0x8   : > { %s1152_s23 = sadd.s32 4294967294, %s1354_s21   ;;  %s1470_s24 = sadd.s32 1, %s1354_s21  }
   0x9   : > { %1750 = sst [smem:[#allocation10_spill]] %s1470_s24  ;;  %s361_s25 = sadd.s32 1, %s1350_s20 }
   0xa   : > { %s358_s26 = ssub.s32 %s1354_s21, %s1470_s24  ;;  %p371_p0 = scmp.ne.s32.totalorder %s1350_s20, %s1346_s19 }
   0xb   : > { %p359_p1 = scmp.eq.s32.totalorder %s358_s26, 0  ;;  %p372_p2 = scmp.eq.s32.totalorder %s1466_s22, 1 }
   0xc   : > { %p377_p3 = scmp.ne.s32.totalorder %s1346_s19, %s1342_s18  ;;  %p378_p4 = scmp.eq.s32.totalorder %s1152_s23, 1 }
   0xd   : > { %s1481_s27 = scalar_select %p359_p1, %s1350_s20, %s361_s25  }
   0xe   : > { %p1483_p5 = por %p372_p2, %p371_p0  ;;  %p1487_p6 = por %p378_p4, %p377_p3 }
   0xf   : > { %1751 = sst [smem:[#allocation11_spill]] %s1481_s27  ;;  %p1153_p7 = scmp.ge.s32.totalorder %s1354_s21, 1 }
  0x10   : > { %s1753_s29 = scalar_select %p1487_p6, 1, 0 }
  0x11   : > { %p385_p8 = scmp.lt.s32.totalorder %s1354_s21, 3  ;;  %p1203_p9 = scmp.eq.s32.totalorder %s1466_s22, 0 }
  0x12   : > { %1754 = sst [smem:[#allocation12_spill]] %s1753_s29  ;;  %s1356_s23 = smov [#allocation3]  }
  0x13   : > { %p386_p10 = pnand %p1153_p7, %p385_p8  ;;  %s1755_s9 = sld [smem:[#allocation14_spill]] }
  0x14   : > { %s419_s25 = sshll.u32 %s1356_s23, 4  ;;  %s1357_s26 = smov 128   ;;  %s420_s25 = int_to_ptr.vmem [resolvable:$true] %s419_s25 }
  0x15   : > { %p1195_p11 = pneg %p386_p10  ;;  %s1358_s27 = smov 8  }
  0x16   : > { %466 = sbr.rel (%p386_p10) target bundleno = 1329 (0x531), region = 80 }
  0x17   : > { %p1196_p12 = pnand %p1203_p9, %p1195_p11 }
  0x19   : > { %s417_s17 = sshll.u32 %s1755_s9, 4  ;;  %s418_s17 = int_to_ptr.hbm [resolvable:$true] %s417_s17 }
  0x1a   : > { %1198 = dma.hbm_to_vmem [thread:$0]  (!%p1196_p12), %s418_s17, 1536, %s420_s25, [#allocation4], %s1357_s26, %s1357_s26, %s1358_s27  }
  0x1b   : > { %1333 = dma.done.wait (%p1203_p9), [#allocation4], 1536  }
  0x1c   : > { %1335 = vsyncadd (%p1203_p9), [#allocation4], 4294965760  ;;  %p520_p13 = scmp.lt.s32.totalorder %s1466_s22, 1  ;;  %v1359_v0 = vmov 0   ;;  %v549_v2 = vld [vmem:[%s1727_s2 + $0x18] sm:$0xff]  ;;  %v548_v3 = vld [vmem:[%s1727_s2 + $0x10] sm:$0xff] }
  0x1d   : > { %1247 = vset.pattern.permute.xlu0 %v1359_v0  ;;  %569 = vmatpush.msra.mxu0 %v549_v2  ;;  %v547_v4 = vld [vmem:[%s1727_s2 + $0x8] sm:$0xff]  ;;  %v546_v6 = vld [vmem:[%s1727_s2] sm:$0xff]  ;;  %s1756_s0 = sld [smem:[#allocation13_spill]]  ;;  %vm550_vm0 = vcmask 261120   ;;  %s1745_s24 = smov 64   ;;  %vm583_vm1 = vcmask 260096  }
  0x1e   : > { %s521_s30 = scalar_select %p520_p13, %s1466_s22, 1  ;;  %v621_v13 = vld [vmem:[%s1728_s3 + $0x58] sm:$0xff]  ;;  %v620_v14 = vld [vmem:[%s1728_s3 + $0x50] sm:$0xff]  ;;  %vm585_vm2 = vcmask 253952   ;;  %v1362_v15 = vmov 0.0   ;;  %v619_v16 = vld [vmem:[%s1728_s3 + $0x48] sm:$0xff] }
  0x1f   : > { %570 = vmatpush.msra.mxu0 %v548_v3  ;;  %637 = vmatpush.msra.mxu1 %v621_v13  ;;  %586 = vst.msk [vmem:[#allocation2] sm:$0x1] %vm585_vm2, %v1362_v15  ;;  %v618_v17 = vld [vmem:[%s1728_s3 + $0x40] sm:$0xff]  ;;  %v617_v18 = vld [vmem:[%s1728_s3 + $0x38] sm:$0xff]  ;;  %v616_v19 = vld [vmem:[%s1728_s3 + $0x30] sm:$0xff]  ;;  %vm593_vm3 = vcmask 523520  }
  0x20   : > { %s1186_s16 = sshll.u32 %s521_s30, 4  ;;  %v615_v20 = vld [vmem:[%s1728_s3 + $0x28] sm:$0xff]  ;;  %v614_v21 = vld [vmem:[%s1728_s3 + $0x20] sm:$0xff]  ;;  %v613_v22 = vld [vmem:[%s1728_s3 + $0x18] sm:$0xff]  ;;  %vm602_vm4 = vcmask 785921   ;;  %vm604_vm5 = vcmask 785920  }
  0x21   : > { %s529_s20 = scalar_lea.vmem %s1726_s1, %s1186_s16  ;;  %571 = vmatpush.msra.mxu0 %v547_v4  ;;  %638 = vmatpush.msra.mxu1 %v620_v14  ;;  %v612_v23 = vld [vmem:[%s1728_s3 + $0x10] sm:$0xff]  ;;  %v611_v24 = vld [vmem:[%s1728_s3 + $0x8] sm:$0xff]  ;;  %v610_v25 = vld [vmem:[%s1728_s3] sm:$0xff]  ;;  %vm606_vm6 = vcmask 778752   ;;  %vm626_vm7 = vcmask 785408   ;;  %vm748_vm8 = vcmask 1043456  }
  0x22   : > { %v530_v1 = vld [vmem:[%s529_s20] sm:$0xff]  ;;  %v531_v5 = vld [vmem:[%s529_s20 + $0x8] sm:$0xff]  ;;  %s1361_s20 = smov 32   ;;  %v660_v32 = vld [vmem:[%s1733_s8 + $0x18] sm:$0xff]  ;;  %vm744_vm9 = vcmask 31744   ;;  %vm895_vm13 = vcmask 523264  }
  0x23   : > { %536 = vperm.xlu0 %1247, %v530_v1   ;;  %572 = vmatpush.msra.mxu0 %v546_v6  ;;  %s524_s17 = scalar_lea.vmem %s1756_s0, %s1186_s16  ;;  %v659_v33 = vld [vmem:[%s1733_s8 + $0x10] sm:$0xff]  ;;  %v658_v34 = vld [vmem:[%s1733_s8 + $0x8] sm:$0xff]  ;;  %v657_v35 = vld [vmem:[%s1733_s8] sm:$0xff]  ;;  %s1757_s16 = smov 64  }
  0x24   : > { %v532_v7 = vld [vmem:[%s524_s17] sm:$0xff]  ;;  %v533_v10 = vld [vmem:[%s524_s17 + $0x8] sm:$0xff]  ;;  %639 = vmatpush.msra.mxu1 %v619_v16  ;;  %698 = vmatpush.msra.mxu2 %v660_v32  ;;  %s1188_s9 = sshll.u32 %s1466_s22, 4  ;;  %s1308_s30 = scalar_lea.hbm %s1740_s15, 32 }
  0x25   : > { %722 = vmatpush.msra.mxu3 %v660_v32  ;;  %v1248_v37 = vld [vmem:[%s1729_s4] ss:$0 sm:$0xff]  ;;  %s1062_s27 = scalar_lea.hbm %s1740_s15, %s1188_s9 }
  0x26   : > { %640 = vmatpush.msra.mxu1 %v618_v17  ;;  %699 = vmatpush.msra.mxu2 %v659_v33  ;;  %v656_v61 = vld [vmem:[%s1732_s7] sm:$0xf]  ;;  %s1065_s29 = sshll.u32 %s1062_s27, 4  ;;  %s1066_s29 = int_to_ptr.hbm [resolvable:$true] %s1065_s29 }
  0x27   : > { %723 = vmatpush.msra.mxu3 %v659_v33  ;;  %v850_v33 = vld [vmem:[#allocation3 + $0x58] sm:$0xff]  ;;  %s1302_s25 = sshra.s32 %s1066_s29, 4  ;;  %s1303_s25 = int_to_ptr.hbm [resolvable:$true] %s1302_s25 }
  0x28   : > { %641 = vmatpush.msra.mxu1 %v617_v18  ;;  %700 = vmatpush.msra.mxu2 %v658_v34  ;;  %p1309_p3 = scmp.lt.s32.totalorder %s1303_s25, %s1740_s15 }
  0x29   : > { %724 = vmatpush.msra.mxu3 %v658_v34  ;;  %v849_v34 = vld [vmem:[#allocation3 + $0x50] sm:$0xff]  ;;  %865 = vmatpush.msrb.mxu0 %v850_v33 }
  0x2a   : > { %642 = vmatpush.msra.mxu1 %v616_v19  ;;  %701 = vmatpush.msra.mxu2 %v657_v35 }
  0x2b   : > { %541 = vperm.xlu0 %1247, %v531_v5   ;;  %725 = vmatpush.msra.mxu3 %v657_v35  ;;  %v848_v35 = vld [vmem:[#allocation3 + $0x48] sm:$0xff] }
  0x2c   : > { %643 = vmatpush.msra.mxu1 %v615_v20  ;;  %1169 = vmatpush.msk.msrb.mxu2 %vm748_vm8, %v656_v61 }
  0x2d   : > { %1171 = vmatpush.msk.msrb.mxu3 %vm748_vm8, %v656_v61  ;;  %866 = vmatpush.msrb.mxu0 %v849_v34  ;;  %v1251_v61 = vld [vmem:[%s1735_s10] ss:$0 sm:$0xff] }
  0x2e   : > { %644 = vmatpush.msra.mxu1 %v614_v21  ;;  %v1249_v21 = vld [vmem:[%s1730_s5] ss:$0 sm:$0xff] }
  0x2f   : > { %867 = vmatpush.msrb.mxu0 %v848_v35 }
  0x30   : > { %645 = vmatpush.msra.mxu1 %v613_v22 }
  0x32   : > { %646 = vmatpush.msra.mxu1 %v612_v23 }
  0x34   : > { %647 = vmatpush.msra.mxu1 %v611_v24  ;;  %v1250_v24 = vld [vmem:[%s1731_s6] ss:$0 sm:$0xff] }
  0x36   : > { %648 = vmatpush.msra.mxu1 %v610_v25 }
  0x95   : > { %v1523_v8 = vpop.permute.xlu0 %536 }
  0x96   : > { %v544_v9 = vmul.f32 %v1523_v8, %v532_v7 }
  0x98   : > { %596 = vrot.lane.b32.xlu2 %v544_v9, %s1745_s24  ;;  %587 = vrot.lane.b32.xlu1 %v544_v9, %s1361_s20  ;;  %582 = vst.msk [vmem:[#allocation2 + $0x1] sm:$0xff] %vm550_vm0, %v544_v9 }
  0x99   : > { %1163 = vmatmul.msk.f32.vlgmr.msra.gmra.mxu0 %vm550_vm0, %v544_v9 }
  0x9d   : > { %v1530_v11 = vpop.permute.xlu0 %541 }
  0x9e   : > { %v545_v12 = vmul.f32 %v1530_v11, %v533_v10 }
  0xa0   : > { %598 = vrot.lane.b32.xlu2 %v545_v12, %s1745_s24  ;;  %589 = vrot.lane.b32.xlu1 %v545_v12, %s1361_s20  ;;  %584 = vst.msk [vmem:[#allocation2 + $0x9] sm:$0x7f] %vm583_vm1, %v545_v12  ;;  %s1304_s24 = scalar_lea.hbm %s1303_s25, 16 }
  0xa1   : > { %1164 = vmatmul.msk.f32.gmra.mxu0 %vm550_vm0, %v545_v12  ;;  %p1305_p0 = scmp.ne.s32.totalorder %s1303_s25, %s1304_s24  ;;  %p1310_p4 = scmp.lt.s32.totalorder %s1308_s30, %s1304_s24 }
  0xa3   : > { %p1306_p1 = pnand %p1305_p0, %p1483_p5  ;;  %p1311_p7 = por %p1310_p4, %p1309_p3 }
  0xa5   : > { %p1307_p2 = pneg %p1306_p1 }
  0xa7   : > { %p1312_p8 = pnand %p1311_p7, %p1307_p2 }
  0xf2   : > { %v597_v26 = vpop.permute.xlu2 %596 }
  0xfa   : > { %v599_v29 = vpop.permute.xlu2 %598 }
 0x10a   : > { %v588_v27 = vpop.permute.xlu1 %587 }
 0x10b   : > { %594 = vst.msk [vmem:[#allocation2] sm:$0xff] %vm593_vm3, %v588_v27 }
 0x10c   : > { %603 = vst.msk [vmem:[#allocation2 - $0x1] sm:$0xfe] %vm602_vm4, %v597_v26 }
 0x112   : > { %v590_v28 = vpop.permute.xlu1 %589 }
 0x113   : > { %595 = vst.msk [vmem:[#allocation2 + $0x8] sm:$0xff] %vm593_vm3, %v590_v28 }
 0x114   : > { %605 = vst.msk [vmem:[#allocation2 + $0x7] sm:$0xff] %vm604_vm5, %v599_v29 }
 0x115   : > { %607 = vst.msk [vmem:[#allocation2 + $0xf] sm:$0x1] %vm606_vm6, %v1362_v15 }
 0x11b   : > { %v608_v30 = vld [vmem:[#allocation2] sm:$0xff] }
 0x11c   : > { %1165 = vmatmul.msk.f32.vlgmr.msra.gmra.mxu1 %vm626_vm7, %v608_v30  ;;  %817 = vst.msk [vmem:[#allocation2] sm:$0x1] %vm585_vm2, %v1362_v15  ;;  %v609_v31 = vld [vmem:[#allocation2 + $0x8] sm:$0xff] }
 0x124   : > { %1166 = vmatmul.msk.f32.gmra.mxu1 %vm626_vm7, %v609_v31 }
 0x199   : > { %v650_v36 = vpop.f32.mrf.mxu1 }
 0x19a   : > { %v651_v38 = vadd.f32 %v1248_v37, %v650_v36  ;;  %v847_v36 = vld [vmem:[#allocation3 + $0x40] sm:$0xff] }
 0x19b   : > { %868 = vmatpush.msrb.mxu0 %v847_v36 }
 0x19c   : > { %v672_v40 = vmul.f32 %v651_v38, %v651_v38  ;;  %v663_v42 = vsel %vm550_vm0, %v651_v38, 0.0 }
 0x19e   : > { %v674_v46 = vsel %vm550_vm0, %v672_v40, 0.0  ;;  %v843_v40 = vld [vmem:[#allocation3 + $0x20] sm:$0xff] }
 0x1a1   : > { %v653_v39 = vpop.f32.mrf.mxu1 }
 0x1a2   : > { %v654_v41 = vadd.f32 %v1248_v37, %v653_v39  ;;  %v846_v37 = vld [vmem:[#allocation3 + $0x38] sm:$0xff]  ;;  %v844_v39 = vld [vmem:[#allocation3 + $0x28] sm:$0xff] }
 0x1a3   : > { %869 = vmatpush.msrb.mxu0 %v846_v37 }
 0x1a4   : > { %v664_v43 = vsel %vm550_vm0, %v654_v41, 0.0  ;;  %v673_v44 = vmul.f32 %v654_v41, %v654_v41 }
 0x1a5   : > { %v665_v45 = vadd.f32 %v664_v43, %v663_v42  ;;  %v841_v42 = vld [vmem:[#allocation3 + $0x10] sm:$0xff]  ;;  %v840_v43 = vld [vmem:[#allocation3 + $0x8] sm:$0xff] }
 0x1a6   : > { %v675_v47 = vsel %vm550_vm0, %v673_v44, 0.0  ;;  %v839_v44 = vld [vmem:[#allocation3] sm:$0xff] }
 0x1a7   : > { %v666_v48 = vrot.slane %v665_v45, 4  ;;  %v676_v49 = vadd.f32 %v675_v47, %v674_v46 }
 0x1a9   : > { %v667_v50 = vadd.f32 %v666_v48, %v665_v45  ;;  %v677_v51 = vrot.slane %v676_v49, 4 }
 0x1ab   : > { %v668_v52 = vrot.slane %v667_v50, 2  ;;  %v678_v53 = vadd.f32 %v677_v51, %v676_v49  ;;  %v892_v51 = vld [vmem:[%s1739_s14 + $0x38] sm:$0xff] }
 0x1ad   : > { %v669_v54 = vadd.f32 %v668_v52, %v667_v50  ;;  %v679_v55 = vrot.slane %v678_v53, 2  ;;  %v1641_v52 = vpop.f32.mrf.mxu0 }
 0x1af   : > { %v670_v56 = vrot.slane %v669_v54, 1  ;;  %v680_v57 = vadd.f32 %v679_v55, %v678_v53  ;;  %v890_v53 = vld [vmem:[%s1739_s14 + $0x28] sm:$0xff]  ;;  %v888_v55 = vld [vmem:[%s1739_s14 + $0x18] sm:$0xff] }
 0x1b1   : > { %v671_v58 = vadd.f32 %v670_v56, %v669_v54  ;;  %v681_v59 = vrot.slane %v680_v57, 1  ;;  %v889_v54 = vld [vmem:[%s1739_s14 + $0x20] sm:$0xff]  ;;  %v887_v56 = vld [vmem:[%s1739_s14 + $0x10] sm:$0xff] }
 0x1b3   : > { %1167 = vmatmul.msk.f32.vlgmr.msra.gmra.mxu2 %vm550_vm0, %v671_v58  ;;  %v682_v60 = vadd.f32 %v681_v59, %v680_v57  ;;  %v886_v57 = vld [vmem:[%s1739_s14 + $0x8] sm:$0xff]  ;;  %v885_v58 = vld [vmem:[%s1739_s14] sm:$0xff] }
 0x1b4   : > { %927 = vmatpush.msra.mxu2 %v892_v51 }
 0x1b5   : > { %1168 = vmatmul.msk.f32.vlgmr.msra.gmra.mxu3 %vm550_vm0, %v682_v60  ;;  %v1661_v59 = vpop.f32.mrf.mxu0 }
 0x1b6   : > { %951 = vmatpush.msra.mxu3 %v892_v51 }
 0x236   : > { %v703_v62 = vpop.f32.mrf.mxu2 }
 0x237   : > { %v706_v63 = vmul.f32 0.0078125, %v703_v62 }
 0x238   : > { %v727_v0 = vpop.f32.mrf.mxu3 }
 0x239   : > { %v731_v1 = vmul.f32 %v706_v63, %v706_v63  ;;  %v730_v2 = vmul.f32 0.0078125, %v727_v0  ;;  %1170 = vmatmul.msk.f32.vlgmr.msrb.gmra.mxu2 %vm744_vm9, %v706_v63 }
 0x23b   : > { %v732_v3 = vsub.f32 %v730_v2, %v731_v1 }
 0x23d   : > { %v733_v4 = vadd.f32 1e-05, %v732_v3 }
 0x23f   : > { %1254 = vrsqrt.f32 %v733_v4  ;;  %vm740_vm11 = vweird.f32 %v733_v4 }
 0x245   : > { %v1255_v5 = vpop.eup %1254 }
 0x246   : > { %v735_v6 = vmul.f32 %v1255_v5, %v733_v4  ;;  %vm741_vm10 = vweird.f32 %v1255_v5 }
 0x247   : > { %vm742_vm12 = vmor %vm740_vm11, %vm741_vm10 }
 0x248   : > { %v736_v7 = vmul.f32 %v1255_v5, %v735_v6 }
 0x24a   : > { %v737_v9 = vmul.f32 0.5, %v736_v7 }
 0x24c   : > { %v738_v10 = vsub.f32 1.5, %v737_v9 }
 0x24e   : > { %v739_v12 = vmul.f32 %v1255_v5, %v738_v10 }
 0x250   : > { %v743_v13 = vsel %vm742_vm12, %v1255_v5, %v739_v12 }
 0x251   : > { %1172 = vmatmul.msk.f32.vlgmr.msrb.gmra.mxu3 %vm744_vm9, %v743_v13 }
 0x2bc   : > { %v769_v14 = vpop.f32.mrf.mxu2 }
 0x2bd   : > { %v795_v16 = vperm.slane %v769_v14, 0 }
 0x2bf   : > { %v796_v18 = vsub.f32 %v651_v38, %v795_v16  ;;  %v797_v19 = vsub.f32 %v654_v41, %v795_v16  ;;  %v845_v38 = vld [vmem:[#allocation3 + $0x30] sm:$0xff]  ;;  %v842_v41 = vld [vmem:[#allocation3 + $0x18] sm:$0xff] }
 0x2c0   : > { %870 = vmatpush.msrb.mxu0 %v845_v38 }
 0x2c2   : > { %871 = vmatpush.msrb.mxu0 %v844_v39 }
 0x2c4   : > { %872 = vmatpush.msrb.mxu0 %v843_v40 }
 0x2c6   : > { %873 = vmatpush.msrb.mxu0 %v842_v41 }
 0x2c8   : > { %874 = vmatpush.msrb.mxu0 %v841_v42 }
 0x2ca   : > { %875 = vmatpush.msrb.mxu0 %v840_v43 }
 0x2cc   : > { %876 = vmatpush.msrb.mxu0 %v839_v44 }
 0x2d4   : > { %v792_v17 = vpop.f32.mrf.mxu3 }
 0x2d5   : > { %v798_v20 = vperm.slane %v792_v17, 0 }
 0x2d7   : > { %v799_v22 = vmul.f32 %v798_v20, %v796_v18  ;;  %v800_v23 = vmul.f32 %v798_v20, %v797_v19 }
 0x2d9   : > { %v804_v25 = vmul.f32 %v1249_v21, %v799_v22  ;;  %v805_v26 = vmul.f32 %v1249_v21, %v800_v23 }
 0x2db   : > { %v810_v27 = vadd.f32 %v1250_v24, %v805_v26  ;;  %v809_v28 = vadd.f32 %v1250_v24, %v804_v25  ;;  %v884_v24 = vld [vmem:[%s1738_s13] sm:$0xf] }
 0x2dc   : > { %1177 = vmatpush.msk.msrb.mxu1 %vm748_vm8, %v884_v24 }
 0x2dd   : > { %v812_v29 = vmul.f32 %v810_v27, %v1530_v11  ;;  %v811_v30 = vmul.f32 %v809_v28, %v1523_v8 }
 0x2df   : > { %v814_v31 = vmax.f32 %v812_v29, 0.0  ;;  %v813_v32 = vmax.f32 %v811_v30, 0.0 }
 0x2e1   : > { %822 = vrot.lane.b32.xlu1 %v814_v31, %s1361_s20  ;;  %816 = vst.msk [vmem:[#allocation2 + $0x9] sm:$0x7f] %vm583_vm1, %v814_v31  ;;  %828 = vrot.lane.b32.xlu2 %v813_v32, %s1757_s16 }
 0x2e2   : > { %815 = vst.msk [vmem:[#allocation2 + $0x1] sm:$0xff] %vm550_vm0, %v813_v32  ;;  %820 = vrot.lane.b32.xlu0 %v813_v32, %s1361_s20  ;;  %s517_s20 = sand.u32 1, %s1346_s19  }
 0x2e3   : > { %s1158_s26 = sshll.u32 %s517_s20, 4 }
 0x2e4   : > { %s519_s17 = scalar_lea.vmem [#allocation6], %s1158_s26 }
 0x2e5   : > { %s1063_s22 = sshll.u32 %s519_s17, 4  ;;  %s1064_s22 = int_to_ptr.vmem [resolvable:$true] %s1063_s22 }
 0x2ea   : > { %830 = vrot.lane.b32.xlu0 %v814_v31, %s1757_s16  ;;  %s1051_s16 = scalar_lea.sflag [#allocation5], %s517_s20 }
 0x33b   : > { %v829_v47 = vpop.permute.xlu2 %828 }
 0x353   : > { %v823_v45 = vpop.permute.xlu1 %822 }
 0x354   : > { %827 = vst.msk [vmem:[#allocation2 + $0x8] sm:$0xff] %vm593_vm3, %v823_v45  ;;  %v821_v46 = vpop.permute.xlu0 %820  ;;  %v1252_v45 = vld [vmem:[%s1736_s11] ss:$0 sm:$0xff] }
 0x355   : > { %836 = vst.msk [vmem:[#allocation2 + $0xf] sm:$0x1] %vm606_vm6, %v1362_v15  ;;  %v891_v15 = vld [vmem:[%s1739_s14 + $0x30] sm:$0xff] }
 0x356   : > { %826 = vst.msk [vmem:[#allocation2] sm:$0xff] %vm593_vm3, %v821_v46  ;;  %928 = vmatpush.msra.mxu2 %v891_v15  ;;  %952 = vmatpush.msra.mxu3 %v891_v15 }
 0x357   : > { %834 = vst.msk [vmem:[#allocation2 - $0x1] sm:$0xfe] %vm602_vm4, %v829_v47 }
 0x358   : > { %929 = vmatpush.msra.mxu2 %v890_v53  ;;  %953 = vmatpush.msra.mxu3 %v890_v53  ;;  %v580_v53 = vmul.f32 %v1641_v52, %v1523_v8 }
 0x35a   : > { %930 = vmatpush.msra.mxu2 %v889_v54  ;;  %954 = vmatpush.msra.mxu3 %v889_v54  ;;  %v581_v54 = vmul.f32 %v1661_v59, %v1530_v11 }
 0x35c   : > { %v831_v48 = vpop.permute.xlu0 %830  ;;  %931 = vmatpush.msra.mxu2 %v888_v55  ;;  %955 = vmatpush.msra.mxu3 %v888_v55 }
 0x35d   : > { %835 = vst.msk [vmem:[#allocation2 + $0x7] sm:$0xff] %vm604_vm5, %v831_v48  ;;  %v1253_v48 = vld [vmem:[%s1737_s12] ss:$0 sm:$0xff] }
 0x35e   : > { %932 = vmatpush.msra.mxu2 %v887_v56  ;;  %956 = vmatpush.msra.mxu3 %v887_v56 }
 0x360   : > { %933 = vmatpush.msra.mxu2 %v886_v57  ;;  %957 = vmatpush.msra.mxu3 %v886_v57 }
 0x362   : > { %934 = vmatpush.msra.mxu2 %v885_v58  ;;  %958 = vmatpush.msra.mxu3 %v885_v58 }
 0x364   : > { %v837_v49 = vld [vmem:[#allocation2] sm:$0xff]  ;;  %v838_v50 = vld [vmem:[#allocation2 + $0x8] sm:$0xff]  ;;  %1179 = vmatpush.msk.msrb.mxu2 %vm748_vm8, %v884_v24 }
 0x365   : > { %1173 = vmatmul.msk.f32.vlgmr.msrb.gmra.mxu0 %vm626_vm7, %v837_v49 }
 0x36d   : > { %1174 = vmatmul.msk.f32.gmra.mxu0 %vm626_vm7, %v838_v50 }
 0x3e2   : > { %v878_v60 = vpop.f32.mrf.mxu0 }
 0x3e3   : > { %v879_v62 = vadd.f32 %v1251_v61, %v878_v60 }
 0x3e5   : > { %v905_v0 = vmul.f32 %v879_v62, %v879_v62  ;;  %v896_v2 = vsel %vm895_vm13, %v879_v62, 0.0 }
 0x3e7   : > { %v907_v6 = vsel %vm895_vm13, %v905_v0, 0.0 }
 0x3ea   : > { %v881_v63 = vpop.f32.mrf.mxu0 }
 0x3eb   : > { %v882_v1 = vadd.f32 %v1251_v61, %v881_v63 }
 0x3ed   : > { %v897_v3 = vsel %vm895_vm13, %v882_v1, 0.0  ;;  %v906_v4 = vmul.f32 %v882_v1, %v882_v1 }
 0x3ee   : > { %v898_v5 = vadd.f32 %v897_v3, %v896_v2 }
 0x3ef   : > { %v908_v7 = vsel %vm895_vm13, %v906_v4, 0.0 }
 0x3f0   : > { %v899_v9 = vrot.slane %v898_v5, 4  ;;  %v909_v10 = vadd.f32 %v908_v7, %v907_v6 }
 0x3f2   : > { %v900_v12 = vadd.f32 %v899_v9, %v898_v5  ;;  %v910_v13 = vrot.slane %v909_v10, 4 }
 0x3f4   : > { %v901_v14 = vrot.slane %v900_v12, 2  ;;  %v911_v16 = vadd.f32 %v910_v13, %v909_v10 }
 0x3f6   : > { %v902_v17 = vadd.f32 %v901_v14, %v900_v12  ;;  %v912_v18 = vrot.slane %v911_v16, 2 }
 0x3f8   : > { %v903_v19 = vrot.slane %v902_v17, 1  ;;  %v913_v20 = vadd.f32 %v912_v18, %v911_v16 }
 0x3fa   : > { %v904_v21 = vadd.f32 %v903_v19, %v902_v17  ;;  %v914_v22 = vrot.slane %v913_v20, 1 }
 0x3fc   : > { %1175 = vmatmul.msk.f32.vlgmr.msra.gmra.mxu2 %vm895_vm13, %v904_v21  ;;  %v915_v23 = vadd.f32 %v914_v22, %v913_v20 }
 0x3fe   : > { %1176 = vmatmul.msk.f32.vlgmr.msra.gmra.mxu3 %vm895_vm13, %v915_v23 }
 0x47f   : > { %v936_v25 = vpop.f32.mrf.mxu2 }
 0x480   : > { %v939_v26 = vmul.f32 0.00390625, %v936_v25 }
 0x481   : > { %v960_v27 = vpop.f32.mrf.mxu3 }
 0x482   : > { %v964_v28 = vmul.f32 %v939_v26, %v939_v26  ;;  %v963_v29 = vmul.f32 0.00390625, %v960_v27  ;;  %1178 = vmatmul.msk.f32.vlgmr.msrb.gmra.mxu1 %vm744_vm9, %v939_v26 }
 0x484   : > { %v965_v30 = vsub.f32 %v963_v29, %v964_v28 }
 0x486   : > { %v966_v31 = vadd.f32 1e-05, %v965_v30 }
 0x488   : > { %1256 = vrsqrt.f32 %v966_v31  ;;  %vm973_vm15 = vweird.f32 %v966_v31 }
 0x48e   : > { %v1257_v32 = vpop.eup %1256 }
 0x48f   : > { %v968_v33 = vmul.f32 %v1257_v32, %v966_v31  ;;  %vm974_vm14 = vweird.f32 %v1257_v32 }
 0x490   : > { %vm975_vm0 = vmor %vm973_vm15, %vm974_vm14 }
 0x491   : > { %v969_v34 = vmul.f32 %v1257_v32, %v968_v33 }
 0x493   : > { %v970_v35 = vmul.f32 0.5, %v969_v34 }
 0x495   : > { %v971_v36 = vsub.f32 1.5, %v970_v35 }
 0x497   : > { %v972_v37 = vmul.f32 %v1257_v32, %v971_v36 }
 0x499   : > { %v976_v38 = vsel %vm975_vm0, %v1257_v32, %v972_v37 }
 0x49a   : > { %1180 = vmatmul.msk.f32.vlgmr.msrb.gmra.mxu2 %vm744_vm9, %v976_v38 }
 0x4ff   : > { %v1000_v39 = vpop.f32.mrf.mxu1 }
 0x500   : > { %v1026_v40 = vperm.slane %v1000_v39, 0 }
 0x502   : > { %v1027_v42 = vsub.f32 %v879_v62, %v1026_v40  ;;  %v1028_v43 = vsub.f32 %v882_v1, %v1026_v40 }
 0x51d   : > { %v1023_v41 = vpop.f32.mrf.mxu2 }
 0x51e   : > { %v1029_v44 = vperm.slane %v1023_v41, 0 }
 0x520   : > { %v1030_v46 = vmul.f32 %v1029_v44, %v1027_v42  ;;  %v1031_v47 = vmul.f32 %v1029_v44, %v1028_v43 }
 0x522   : > { %v1035_v49 = vmul.f32 %v1252_v45, %v1030_v46  ;;  %v1036_v50 = vmul.f32 %v1252_v45, %v1031_v47 }
 0x524   : > { %v1040_v51 = vadd.f32 %v1253_v48, %v1035_v49  ;;  %v1041_v15 = vadd.f32 %v1253_v48, %v1036_v50 }
 0x526   : > { %v1042_v55 = vmul.f32 %v1040_v51, %v1523_v8  ;;  %v1043_v56 = vmul.f32 %v1041_v15, %v1530_v11 }
 0x528   : > { %v1044_v57 = vadd.f32 %v1042_v55, %v580_v53  ;;  %v1045_v58 = vadd.f32 %v1043_v56, %v581_v54 }
 0x52a   : > { %v1046_v60 = vmax.f32 %v1044_v57, 0.0  ;;  %v1047_v61 = vmax.f32 %v1045_v58, 0.0 }
 0x52c   : > { %1048 = vst.msk [vmem:[%s519_s17] sm:$0xff] %vm895_vm13, %v1046_v60 }
 0x52d   : > { %1049 = vst.msk [vmem:[%s519_s17 + $0x8] sm:$0xff] %vm895_vm13, %v1047_v61 }
 0x52e   : > { %1315 = shalt.err (!%p1312_p8)
}
 0x52f   : > { %s1363_s20 = smov 128   ;;  %s1364_s17 = smov 8  }
 0x530   : > { %1193 = dma.vmem_to_hbm [thread:$0]  (%p1483_p5), %s1064_s22, 256, %s1066_s29, %s1051_s16, %s1363_s20, %s1363_s20, %s1364_s17  }
 0x531 PF: > { %p1205_p9 = scmp.ge.s32.totalorder %s1354_s21, 2  ;;  %s1080_s26 = sand.u32 1, %s1342_s18  }
 0x532   : > { %s1081_s9 = scalar_lea.sflag [#allocation5], %s1080_s26 }
 0x533   : > { %p1200_p10 = pnand %p1205_p9, %p1487_p6 }
 0x535   : > { %p1201_p11 = pneg %p1200_p10 }
 0x537   : > { %1337 = dma.done.wait (%p1201_p11), %s1081_s9, 256  }
 0x538   : > { %1339 = vsyncadd (%p1201_p11), %s1081_s9, 4294967040  ;;  %s1759_s21 = sld [smem:[#allocation10_spill]]  ;;  %s1762_s18 = smov %s1346_s19 }
 0x539   : > { %s1760_s25 = sld [smem:[#allocation9_spill]] }
 0x53a   : > { %s1761_s20 = sld [smem:[#allocation11_spill]] }
 0x53e   : > { %p26_p12 = scmp.ge.s32.totalorder %s1759_s21, 4  }
 0x53f   : > { %s1763_s19 = smov %s1760_s25 }
 0x540   :  { %28 = sbr.rel (!%p26_p12) target bundleno = 7 (0x7), region = 123 }
 0x545   :  { %1087 = vsyncpa [#allocation4], 1 }
 0x546   :  { %1089 = vsyncpa [#allocation4 + $0x1], 1 }
 0x547   :  { %1090 = vsyncpa [#allocation5], 1 }
 0x548   :  { %1092 = vsyncpa [#allocation5 + $0x1], 1 }

</bundles_post_ra>
